<compile_context>
chip_gen: v5e
topology: v5e:2x2
jax: 0.10.0
libtpu: 0.0.40
codegen_flags: <defaults>
</compile_context>

<pallas_src>
import jax
import jax.numpy as jnp
from jax.experimental import pallas as pl
from jax.experimental.pallas import tpu as pltpu

_LANE = 128      # TPU lane width; also the zero-border width of the conv scratch
_BN_EPS = 1e-5   # PyTorch BatchNorm1d default


def _round_up(x, m):
    return (x + m - 1) // m * m


def _same_left_pad(k):
    """Left zero-padding used by Conv1dSamePadding (stride=1, dilation=1).

    Total padding is k-1; when that is odd PyTorch does F.pad(input, [0, 1])
    first, i.e. the extra zero goes on the right.
    """
    pad_total = k - 1
    if pad_total % 2 != 0:
        return (pad_total - 1) // 2
    return pad_total // 2


def _im2col_weight(w):
    """(Co, Ci, K) conv weight -> (Co, K*Ci) bf16, tap-major / channel-minor."""
    co = w.shape[0]
    return jnp.transpose(w, (0, 2, 1)).reshape(co, -1).astype(jnp.bfloat16)


def _vmem_limit(scratch_bytes, stream_bytes):
    # scratch + double-buffered pipeline blocks, with slack for compiler
    # internals; never below the platform default, never (almost) all of VMEM.
    est = int((scratch_bytes + 2 * stream_bytes) * 1.5) + (4 << 20)
    return int(min(max(est, 32 << 20), 96 << 20))


# ----------------------------------------------------------------------------
# Pallas kernels
# ----------------------------------------------------------------------------
def _make_block_kernel(main_convs, use_res, L, Lp, emit_sum):
    """Fused InceptionBlock kernel (one batch element per grid step).

    main_convs: static tuple of (cin, cout, k) — optional 1x1 bottleneck
    followed by the three conv layers.
    """
    n_main = len(main_convs)

    def kernel(*args):
        x_ref = args[0]
        w_refs = args[1:1 + n_main]
        pos = 1 + n_main
        wr_ref = None
        if use_res:
            wr_ref = args[pos]
            pos += 1
        main_ref = args[pos]
        pos += 1
        res_ref = rsum_ref = rsq_ref = fsum_ref = None
        if use_res:
            res_ref, rsum_ref, rsq_ref = args[pos:pos + 3]
            pos += 3
        if emit_sum:
            fsum_ref = args[pos]
            pos += 1
        xpad, im2col = args[pos], args[pos + 1]

        # Lane-validity mask built once per kernel; broadcasts against (co, Lp).
        lane_valid = None
        if L != Lp:
            lane_valid = jax.lax.broadcasted_iota(jnp.int32, (1, Lp), 1) < L

        def mask_tail(y):
            # Keep the lane-padding tail (columns >= L) at exactly zero so the
            # next same-padded conv / BN stats / temporal sum see the true
            # length-L signal while every HBM tile stays lane-dense.
            if lane_valid is None:
                return y
            return jnp.where(lane_valid, y, 0.0)

        # Zero only the two 128-lane border strips of the padded-activation
        # scratch: the interior is fully overwritten by every k>1 conv before
        # it is read, and the borders are never written below.  Done every
        # grid step so each TensorCore's private scratch is initialised even
        # when the batch grid is sharded across cores.
        xpad[:, 0:_LANE] = jnp.zeros((xpad.shape[0], _LANE), xpad.dtype)
        xpad[:, _LANE + Lp:] = jnp.zeros((xpad.shape[0], _LANE), xpad.dtype)

        def conv_same(act, w_ref, ci, k):
            # act:   (ci, Lp) f32 or bf16 with zero columns >= L.
            # w_ref: (co, k*ci) bf16, tap-major / channel-minor (host reshape).
            # Returns (co, Lp) f32 == PyTorch Conv1dSamePadding over length L.
            if k == 1:
                # zero input tail -> zero output tail: no mask needed.
                return jnp.dot(w_ref[...], act.astype(jnp.bfloat16),
                               preferred_element_type=jnp.float32)
            left = _same_left_pad(k)
            # 'same' zero padding lives in VMEM: the bf16 activation sits
            # inside a zero border (xpad) and the im2col RHS is assembled from
            # k shifted full-width reads, so the whole conv is ONE
            # (co, k*ci) x (k*ci, Lp) MXU matmul.
            xpad[0:ci, _LANE:_LANE + Lp] = act.astype(jnp.bfloat16)
            for j in range(k):
                c0 = _LANE + j - left
                im2col[j * ci:(j + 1) * ci, :] = xpad[0:ci, c0:c0 + Lp]
            y = jnp.dot(w_ref[...], im2col[0:k * ci, :],
                        preferred_element_type=jnp.float32)
            return mask_tail(y)

        x = x_ref[0]                                      # (cin, Lp) bf16, zero tail
        h = x
        for wi, (ci, _co, k) in enumerate(main_convs):    # bottleneck + 3 convs
            h = conv_same(h, w_refs[wi], ci, k)           # h is f32 after first conv
        main_ref[0] = h.astype(main_ref.dtype)

        if use_res:
            r = conv_same(x, wr_ref, x.shape[0], 1)       # residual 1x1 conv (f32)
            res_ref[0] = r.astype(res_ref.dtype)
            # Per-batch partial sums for training-mode BatchNorm statistics.
            rsum_ref[0] = jnp.sum(r, axis=1, keepdims=True)
            rsq_ref[0] = jnp.sum(r * r, axis=1, keepdims=True)

        if emit_sum:
            # Final block without residual: emit the temporal sum here so the
            # head never has to re-read the (N, C, Lp) activation from HBM.
            fsum_ref[0] = jnp.sum(h, axis=1, keepdims=True)

    return kernel


def _make_bn_relu_add_kernel(L, Lp, emit_sum):
    """out = main + relu(res * scale + shift); optionally also the temporal sum."""

    def kernel(main_ref, res_ref, scale_ref, shift_ref, *out_refs):
        o_ref = out_refs[0]
        y = jnp.maximum(
            res_ref[0].astype(jnp.float32) * scale_ref[0] + shift_ref[0], 0.0)
        out = main_ref[0].astype(jnp.float32) + y
        if L != Lp:
            lane_valid = jax.lax.broadcasted_iota(jnp.int32, (1, Lp), 1) < L
            out = jnp.where(lane_valid, out, 0.0)
        o_ref[0] = out.astype(o_ref.dtype)
        if emit_sum:
            out_refs[1][0] = jnp.sum(out, axis=1, keepdims=True)

    return kernel


# ----------------------------------------------------------------------------
# pallas_call wrappers
# ----------------------------------------------------------------------------
def _apply_block(bp, meta, x, L, is_last):
    """Run one InceptionBlock.  Returns (activation (N,Cout,Lp) bf16, fsum-or-None)."""
    n, cin, Lp = x.shape
    main_convs = meta['main_convs']           # tuple of (ci, co, k), static
    use_res = meta['use_res']
    w_list = bp['main_ws']
    cout = main_convs[-1][1]
    emit_sum_in_block = is_last and (not use_res)

    # VMEM scratch sizing (only k>1 convs use it; kernel_size>3 guarantees one).
    ci_max = max(ci for (ci, _co, k) in main_convs if k > 1)
    max_kc = max(ci * k for (ci, _co, k) in main_convs if k > 1)
    k_max = max(k for (_ci, _co, k) in main_convs)
    # The fixed 128-lane zero border only supports same-padding shifts <= 128.
    assert k_max - 1 <= _LANE, "kernel size too large for the 128-lane halo"

    inputs = [x] + list(w_list)
    in_specs = [pl.BlockSpec((1, cin, Lp), lambda b: (b, 0, 0))]
    in_specs += [pl.BlockSpec(tuple(w.shape), lambda b: (0, 0)) for w in w_list]
    if use_res:
        res_w = bp['res']['w']
        inputs.append(res_w)
        in_specs.append(pl.BlockSpec(tuple(res_w.shape), lambda b: (0, 0)))

    act_spec = pl.BlockSpec((1, cout, Lp), lambda b: (b, 0, 0))
    stat_spec = pl.BlockSpec((1, cout, 1), lambda b: (b, 0, 0))

    out_shapes = [jax.ShapeDtypeStruct((n, cout, Lp), jnp.bfloat16)]
    out_specs = [act_spec]
    if use_res:
        out_shapes += [jax.ShapeDtypeStruct((n, cout, Lp), jnp.bfloat16),
                       jax.ShapeDtypeStruct((n, cout, 1), jnp.float32),
                       jax.ShapeDtypeStruct((n, cout, 1), jnp.float32)]
        out_specs += [act_spec, stat_spec, stat_spec]
    if emit_sum_in_block:
        out_shapes.append(jax.ShapeDtypeStruct((n, cout, 1), jnp.float32))
        out_specs.append(stat_spec)

    scratch_bytes = (ci_max * (Lp + 2 * _LANE) + max_kc * Lp) * 2  # bf16 scratch
    stream_bytes = cin * Lp * 2
    stream_bytes += sum(int(w.size) for w in inputs[1:]) * 2
    stream_bytes += sum(int(s.shape[1]) * int(s.shape[2]) * jnp.dtype(s.dtype).itemsize
                        for s in out_shapes)

    result = pl.pallas_call(
        _make_block_kernel(main_convs, use_res, L, Lp, emit_sum_in_block),
        out_shape=tuple(out_shapes),
        grid=(n,),
        in_specs=in_specs,
        out_specs=tuple(out_specs),
        scratch_shapes=[pltpu.VMEM((ci_max, Lp + 2 * _LANE), jnp.bfloat16),  # zero-bordered act
                        pltpu.VMEM((max_kc, Lp), jnp.bfloat16)],             # im2col RHS
        compiler_params=pltpu.CompilerParams(
            dimension_semantics=("parallel",),
            vmem_limit_bytes=_vmem_limit(scratch_bytes, stream_bytes)),
    )(*inputs)

    if not use_res:
        if emit_sum_in_block:
            main, fsum = result
            return main, fsum
        (main,) = result
        return main, None

    main, res, rsum, rsq = result
    # Training-mode BatchNorm statistics over (N, L), folded into a per-channel
    # scale/shift.  O(C) work -> plain jnp glue.
    count = float(n * L)
    mean = jnp.sum(rsum[:, :, 0], axis=0) / count
    var = jnp.sum(rsq[:, :, 0], axis=0) / count - mean * mean    # biased variance
    var = jnp.maximum(var, 0.0)                                  # guard cancellation
    scale = bp['res']['gamma'] * jax.lax.rsqrt(var + _BN_EPS)
    shift = bp['res']['beta'] - mean * scale

    out_shapes2 = [jax.ShapeDtypeStruct((n, cout, Lp), jnp.bfloat16)]
    out_specs2 = [act_spec]
    if is_last:
        out_shapes2.append(jax.ShapeDtypeStruct((n, cout, 1), jnp.float32))
        out_specs2.append(stat_spec)

    stream2 = 3 * cout * Lp * 2 + 3 * cout * 4
    result2 = pl.pallas_call(
        _make_bn_relu_add_kernel(L, Lp, is_last),
        out_shape=tuple(out_shapes2),
        grid=(n,),
        in_specs=[act_spec, act_spec,
                  pl.BlockSpec((1, cout, 1), lambda b: (0, 0, 0)),
                  pl.BlockSpec((1, cout, 1), lambda b: (0, 0, 0))],
        out_specs=tuple(out_specs2),
        compiler_params=pltpu.CompilerParams(
            dimension_semantics=("parallel",),
            vmem_limit_bytes=_vmem_limit(0, stream2)),
    )(main, res, scale.reshape(1, cout, 1), shift.reshape(1, cout, 1))

    if is_last:
        out, fsum = result2
        return out, fsum
    (out,) = result2
    return out, None


# ----------------------------------------------------------------------------
# Model construction (params + forward closure over static per-block metadata)
# ----------------------------------------------------------------------------
def make_model(key, *, num_blocks, in_channels, out_channels,
               bottleneck_channels, kernel_sizes, use_residuals='default',
               num_pred_classes=1):
    def expand(v):
        if isinstance(v, list):
            assert len(v) == num_blocks
            return v
        return [v] * num_blocks

    outs = expand(out_channels)
    bcs = expand(bottleneck_channels)
    ks = expand(kernel_sizes)
    if use_residuals == 'default':
        use_res_l = [i % 3 == 2 for i in range(num_blocks)]
    else:
        use_res_l = expand(use_residuals)
    channels = [in_channels] + outs

    blocks_p = []
    blocks_meta = []
    for i in range(num_blocks):
        c_in, c_out, bc, k = channels[i], channels[i + 1], bcs[i], ks[i]
        assert k > 3, 'Kernel size must be strictly greater than 3'
        key, *sub = jax.random.split(key, 8)
        use_bneck = bc > 0
        raw = []
        if use_bneck:
            raw.append(0.1 * jax.random.normal(sub[0], (bc, c_in, 1), jnp.float32))
        ksizes = [k // (2 ** j) for j in range(3)]
        cs = [bc if use_bneck else c_in] + [c_out] * 3
        for j in range(3):
            raw.append(0.1 * jax.random.normal(
                sub[1 + j], (cs[j + 1], cs[j], ksizes[j]), jnp.float32))

        # Static (Python) metadata stays out of the jitted params pytree.
        blocks_meta.append({
            'main_convs': tuple((int(w.shape[1]), int(w.shape[0]), int(w.shape[2]))
                                for w in raw),
            'use_res': bool(use_res_l[i]),
        })
        # Kernel-ready weights are prepared ONCE here (im2col layout, bf16).
        bp = {'main_ws': [_im2col_weight(w) for w in raw]}
        if use_res_l[i]:
            bp['res'] = {
                'w': _im2col_weight(0.1 * jax.random.normal(
                    sub[4], (c_out, c_in, 1), jnp.float32)),
                'gamma': jnp.ones((c_out,), jnp.float32),   # PyTorch BN default init
                'beta': jnp.zeros((c_out,), jnp.float32),
            }
        blocks_p.append(bp)

    key, k1, k2 = jax.random.split(key, 3)
    params = {
        'blocks': blocks_p,
        'linear_w': 0.1 * jax.random.normal(k1, (num_pred_classes, channels[-1]), jnp.float32),
        'linear_b': 0.1 * jax.random.normal(k2, (num_pred_classes,), jnp.float32),
    }

    n_blocks = num_blocks

    def forward(params, x):
        # x: (N, C_in, L) float32
        _n, _cin, L = x.shape
        Lp = _round_up(L, _LANE)      # lane-dense length carried through the net
        if Lp != L:
            # One-time zero pad; every kernel keeps the tail at zero so all
            # intermediate HBM tiles are full, unmasked (8,128) stores.
            x = jnp.pad(x, ((0, 0), (0, 0), (0, Lp - L)))
        x = x.astype(jnp.bfloat16)    # bf16 inter-block activations
        fsum = None
        for bi in range(n_blocks):
            x, fsum = _apply_block(params['blocks'][bi], blocks_meta[bi], x, L,
                                   is_last=(bi == n_blocks - 1))
        # Temporal mean comes fused out of the last kernel as a per-batch sum;
        # the tiny num_classes Linear is plain jnp on (N, C).
        feat = (fsum[:, :, 0] * (1.0 / float(L))).astype(jnp.float32)   # (N, C)
        return feat @ params['linear_w'].T + params['linear_b']

    return params, forward


# ----------------------------------------------------------------------------
if __name__ == "__main__":
    key = jax.random.PRNGKey(0)
    pkey, xkey = jax.random.split(key)

    # Small config: 3 blocks so the default residual pattern [F, F, T] fires.
    params, forward = make_model(
        pkey,
        num_blocks=3,
        in_channels=4,
        out_channels=8,
        bottleneck_channels=4,
        kernel_sizes=9,          # per-block conv kernels: [9, 4, 2]
        use_residuals='default',
        num_pred_classes=3,
    )

    x = jax.random.normal(xkey, (2, 4, 16), jnp.float32)   # (N, C_in, L)

    fwd = jax.jit(forward)
    out = fwd(params, x)
    jax.block_until_ready(out)

    assert out.shape == (2, 3) and out.dtype == jnp.float32
    print("KERNEL_OK")
</pallas_src>

<mosaic_0001>
module attributes {stable_mosaic.version = 11 : i64} {
  func.func @kernel(%arg0: i32, %arg1: memref<1x8x128xbf16, #tpu.memory_space<vmem>>, %arg2: memref<4x8xbf16, #tpu.memory_space<vmem>>, %arg3: memref<8x36xbf16, #tpu.memory_space<vmem>>, %arg4: memref<8x32xbf16, #tpu.memory_space<vmem>>, %arg5: memref<8x16xbf16, #tpu.memory_space<vmem>>, %arg6: memref<1x8x128xbf16, #tpu.memory_space<vmem>>, %arg7: memref<8x384xbf16, #tpu.memory_space<vmem>>, %arg8: memref<36x128xbf16, #tpu.memory_space<vmem>>) attributes {dimension_semantics = [#tpu.dimension_semantics<parallel>], iteration_bounds = array<i64: 2>, scalar_prefetch = 0 : i64, scratch_operands = 2 : i64, tpu.core_type = #tpu.core_type<tc>, window_params = [{transform_indices = @transform_0, window_bounds = array<i64: 1, 8, 128>}, {pipeline_mode = #tpu.pipeline_mode<synchronous>, transform_indices = @transform_1, window_bounds = array<i64: 4, 8>}, {pipeline_mode = #tpu.pipeline_mode<synchronous>, transform_indices = @transform_2, window_bounds = array<i64: 8, 36>}, {pipeline_mode = #tpu.pipeline_mode<synchronous>, transform_indices = @transform_3, window_bounds = array<i64: 8, 32>}, {pipeline_mode = #tpu.pipeline_mode<synchronous>, transform_indices = @transform_4, window_bounds = array<i64: 8, 16>}, {transform_indices = @transform_5, window_bounds = array<i64: 1, 8, 128>}]} {
    %0 = tpu.iota {dimensions = array<i32: 1>} : vector<1x128xi32>
    %c16_i32 = arith.constant 16 : i32
    %1 = vector.broadcast %c16_i32 : i32 to vector<1x128xi32>
    %2 = arith.cmpi slt, %0, %1 : vector<1x128xi32>
    %cst = arith.constant 0.000000e+00 : bf16
    %3 = vector.broadcast %cst : bf16 to vector<8x128xbf16>
    %c0 = arith.constant 0 : index
    %c0_0 = arith.constant 0 : index
    %4 = vector.load %arg7[%c0, %c0_0] : memref<8x384xbf16, #tpu.memory_space<vmem>>, vector<8x128xbf16>
    tpu.vector_store %arg7[%c0, %c0_0], %3 {strides = array<i32>} : memref<8x384xbf16, #tpu.memory_space<vmem>>, vector<8x128xbf16>,
    %cst_1 = arith.constant 0.000000e+00 : bf16
    %5 = vector.broadcast %cst_1 : bf16 to vector<8x128xbf16>
    %c0_2 = arith.constant 0 : index
    %c256 = arith.constant 256 : index
    %6 = vector.load %arg7[%c0_2, %c256] : memref<8x384xbf16, #tpu.memory_space<vmem>>, vector<8x128xbf16>
    tpu.vector_store %arg7[%c0_2, %c256], %5 {strides = array<i32>} : memref<8x384xbf16, #tpu.memory_space<vmem>>, vector<8x128xbf16>,
    %c0_3 = arith.constant 0 : index
    %c0_4 = arith.constant 0 : index
    %c0_5 = arith.constant 0 : index
    %7 = vector.load %arg1[%c0_3, %c0_4, %c0_5] : memref<1x8x128xbf16, #tpu.memory_space<vmem>>, vector<1x8x128xbf16>
    %8 = vector.shape_cast %7 : vector<1x8x128xbf16> to vector<8x128xbf16>
    %c0_6 = arith.constant 0 : index
    %c0_7 = arith.constant 0 : index
    %9 = vector.load %arg2[%c0_6, %c0_7] : memref<4x8xbf16, #tpu.memory_space<vmem>>, vector<4x8xbf16>
    %cst_8 = arith.constant dense<0.000000e+00> : vector<4x128xf32>
    %10 = tpu.matmul %9, %8, %cst_8 {dimension_numbers = #tpu.dot_dimension_numbers<[1], [0], [0], [1], [0, 0, 1, 1], [], []>} : vector<4x8xbf16>, vector<8x128xbf16>, vector<4x128xf32> -> vector<4x128xf32>
    %11 = arith.truncf %10 : vector<4x128xf32> to vector<4x128xbf16>
    %c0_9 = arith.constant 0 : index
    %c128 = arith.constant 128 : index
    %12 = vector.load %arg7[%c0_9, %c128] : memref<8x384xbf16, #tpu.memory_space<vmem>>, vector<4x128xbf16>
    tpu.vector_store %arg7[%c0_9, %c128], %11 {strides = array<i32>} : memref<8x384xbf16, #tpu.memory_space<vmem>>, vector<4x128xbf16>,
    %c0_10 = arith.constant 0 : index
    %c124 = arith.constant 124 : index
    %13 = vector.load %arg7[%c0_10, %c124] : memref<8x384xbf16, #tpu.memory_space<vmem>>, vector<4x128xbf16>
    %c0_11 = arith.constant 0 : index
    %c0_12 = arith.constant 0 : index
    %14 = vector.load %arg8[%c0_11, %c0_12] : memref<36x128xbf16, #tpu.memory_space<vmem>>, vector<4x128xbf16>
    tpu.vector_store %arg8[%c0_11, %c0_12], %13 {strides = array<i32>} : memref<36x128xbf16, #tpu.memory_space<vmem>>, vector<4x128xbf16>,
    %c0_13 = arith.constant 0 : index
    %c125 = arith.constant 125 : index
    %15 = vector.load %arg7[%c0_13, %c125] : memref<8x384xbf16, #tpu.memory_space<vmem>>, vector<4x128xbf16>
    %c4 = arith.constant 4 : index
    %c0_14 = arith.constant 0 : index
    %16 = vector.load %arg8[%c4, %c0_14] : memref<36x128xbf16, #tpu.memory_space<vmem>>, vector<4x128xbf16>
    tpu.vector_store %arg8[%c4, %c0_14], %15 {strides = array<i32>} : memref<36x128xbf16, #tpu.memory_space<vmem>>, vector<4x128xbf16>,
    %c0_15 = arith.constant 0 : index
    %c126 = arith.constant 126 : index
    %17 = vector.load %arg7[%c0_15, %c126] : memref<8x384xbf16, #tpu.memory_space<vmem>>, vector<4x128xbf16>
    %c8 = arith.constant 8 : index
    %c0_16 = arith.constant 0 : index
    %18 = vector.load %arg8[%c8, %c0_16] : memref<36x128xbf16, #tpu.memory_space<vmem>>, vector<4x128xbf16>
    tpu.vector_store %arg8[%c8, %c0_16], %17 {strides = array<i32>} : memref<36x128xbf16, #tpu.memory_space<vmem>>, vector<4x128xbf16>,
    %c0_17 = arith.constant 0 : index
    %c127 = arith.constant 127 : index
    %19 = vector.load %arg7[%c0_17, %c127] : memref<8x384xbf16, #tpu.memory_space<vmem>>, vector<4x128xbf16>
    %c12 = arith.constant 12 : index
    %c0_18 = arith.constant 0 : index
    %20 = vector.load %arg8[%c12, %c0_18] : memref<36x128xbf16, #tpu.memory_space<vmem>>, vector<4x128xbf16>
    tpu.vector_store %arg8[%c12, %c0_18], %19 {strides = array<i32>} : memref<36x128xbf16, #tpu.memory_space<vmem>>, vector<4x128xbf16>,
    %c0_19 = arith.constant 0 : index
    %c128_20 = arith.constant 128 : index
    %21 = vector.load %arg7[%c0_19, %c128_20] : memref<8x384xbf16, #tpu.memory_space<vmem>>, vector<4x128xbf16>
    %c16 = arith.constant 16 : index
    %c0_21 = arith.constant 0 : index
    %22 = vector.load %arg8[%c16, %c0_21] : memref<36x128xbf16, #tpu.memory_space<vmem>>, vector<4x128xbf16>
    tpu.vector_store %arg8[%c16, %c0_21], %21 {strides = array<i32>} : memref<36x128xbf16, #tpu.memory_space<vmem>>, vector<4x128xbf16>,
    %c0_22 = arith.constant 0 : index
    %c129 = arith.constant 129 : index
    %23 = vector.load %arg7[%c0_22, %c129] : memref<8x384xbf16, #tpu.memory_space<vmem>>, vector<4x128xbf16>
    %c20 = arith.constant 20 : index
    %c0_23 = arith.constant 0 : index
    %24 = vector.load %arg8[%c20, %c0_23] : memref<36x128xbf16, #tpu.memory_space<vmem>>, vector<4x128xbf16>
    tpu.vector_store %arg8[%c20, %c0_23], %23 {strides = array<i32>} : memref<36x128xbf16, #tpu.memory_space<vmem>>, vector<4x128xbf16>,
    %c0_24 = arith.constant 0 : index
    %c130 = arith.constant 130 : index
    %25 = vector.load %arg7[%c0_24, %c130] : memref<8x384xbf16, #tpu.memory_space<vmem>>, vector<4x128xbf16>
    %c24 = arith.constant 24 : index
    %c0_25 = arith.constant 0 : index
    %26 = vector.load %arg8[%c24, %c0_25] : memref<36x128xbf16, #tpu.memory_space<vmem>>, vector<4x128xbf16>
    tpu.vector_store %arg8[%c24, %c0_25], %25 {strides = array<i32>} : memref<36x128xbf16, #tpu.memory_space<vmem>>, vector<4x128xbf16>,
    %c0_26 = arith.constant 0 : index
    %c131 = arith.constant 131 : index
    %27 = vector.load %arg7[%c0_26, %c131] : memref<8x384xbf16, #tpu.memory_space<vmem>>, vector<4x128xbf16>
    %c28 = arith.constant 28 : index
    %c0_27 = arith.constant 0 : index
    %28 = vector.load %arg8[%c28, %c0_27] : memref<36x128xbf16, #tpu.memory_space<vmem>>, vector<4x128xbf16>
    tpu.vector_store %arg8[%c28, %c0_27], %27 {strides = array<i32>} : memref<36x128xbf16, #tpu.memory_space<vmem>>, vector<4x128xbf16>,
    %c0_28 = arith.constant 0 : index
    %c132 = arith.constant 132 : index
    %29 = vector.load %arg7[%c0_28, %c132] : memref<8x384xbf16, #tpu.memory_space<vmem>>, vector<4x128xbf16>
    %c32 = arith.constant 32 : index
    %c0_29 = arith.constant 0 : index
    %30 = vector.load %arg8[%c32, %c0_29] : memref<36x128xbf16, #tpu.memory_space<vmem>>, vector<4x128xbf16>
    tpu.vector_store %arg8[%c32, %c0_29], %29 {strides = array<i32>} : memref<36x128xbf16, #tpu.memory_space<vmem>>, vector<4x128xbf16>,
    %c0_30 = arith.constant 0 : index
    %c0_31 = arith.constant 0 : index
    %31 = vector.load %arg3[%c0_30, %c0_31] : memref<8x36xbf16, #tpu.memory_space<vmem>>, vector<8x36xbf16>
    %c0_32 = arith.constant 0 : index
    %c0_33 = arith.constant 0 : index
    %32 = vector.load %arg8[%c0_32, %c0_33] : memref<36x128xbf16, #tpu.memory_space<vmem>>, vector<36x128xbf16>
    %cst_34 = arith.constant dense<0.000000e+00> : vector<8x128xf32>
    %33 = tpu.matmul %31, %32, %cst_34 {dimension_numbers = #tpu.dot_dimension_numbers<[1], [0], [0], [1], [0, 0, 1, 1], [], []>} : vector<8x36xbf16>, vector<36x128xbf16>, vector<8x128xf32> -> vector<8x128xf32>
    %cst_35 = arith.constant 0.000000e+00 : f32
    %34 = vector.shape_cast %2 : vector<1x128xi1> to vector<1x128xi1>
    %35 = vector.broadcast %34 : vector<1x128xi1> to vector<8x128xi1>
    %36 = vector.broadcast %cst_35 : f32 to vector<8x128xf32>
    %37 = arith.select %35, %33, %36 : vector<8x128xi1>, vector<8x128xf32>
    %38 = arith.truncf %37 : vector<8x128xf32> to vector<8x128xbf16>
    %c0_36 = arith.constant 0 : index
    %c128_37 = arith.constant 128 : index
    %39 = vector.load %arg7[%c0_36, %c128_37] : memref<8x384xbf16, #tpu.memory_space<vmem>>, vector<8x128xbf16>
    tpu.vector_store %arg7[%c0_36, %c128_37], %38 {strides = array<i32>} : memref<8x384xbf16, #tpu.memory_space<vmem>>, vector<8x128xbf16>,
    %c0_38 = arith.constant 0 : index
    %c127_39 = arith.constant 127 : index
    %40 = vector.load %arg7[%c0_38, %c127_39] : memref<8x384xbf16, #tpu.memory_space<vmem>>, vector<8x128xbf16>
    %c0_40 = arith.constant 0 : index
    %c0_41 = arith.constant 0 : index
    %41 = vector.load %arg8[%c0_40, %c0_41] : memref<36x128xbf16, #tpu.memory_space<vmem>>, vector<8x128xbf16>
    tpu.vector_store %arg8[%c0_40, %c0_41], %40 {strides = array<i32>} : memref<36x128xbf16, #tpu.memory_space<vmem>>, vector<8x128xbf16>,
    %c0_42 = arith.constant 0 : index
    %c128_43 = arith.constant 128 : index
    %42 = vector.load %arg7[%c0_42, %c128_43] : memref<8x384xbf16, #tpu.memory_space<vmem>>, vector<8x128xbf16>
    %c8_44 = arith.constant 8 : index
    %c0_45 = arith.constant 0 : index
    %43 = vector.load %arg8[%c8_44, %c0_45] : memref<36x128xbf16, #tpu.memory_space<vmem>>, vector<8x128xbf16>
    tpu.vector_store %arg8[%c8_44, %c0_45], %42 {strides = array<i32>} : memref<36x128xbf16, #tpu.memory_space<vmem>>, vector<8x128xbf16>,
    %c0_46 = arith.constant 0 : index
    %c129_47 = arith.constant 129 : index
    %44 = vector.load %arg7[%c0_46, %c129_47] : memref<8x384xbf16, #tpu.memory_space<vmem>>, vector<8x128xbf16>
    %c16_48 = arith.constant 16 : index
    %c0_49 = arith.constant 0 : index
    %45 = vector.load %arg8[%c16_48, %c0_49] : memref<36x128xbf16, #tpu.memory_space<vmem>>, vector<8x128xbf16>
    tpu.vector_store %arg8[%c16_48, %c0_49], %44 {strides = array<i32>} : memref<36x128xbf16, #tpu.memory_space<vmem>>, vector<8x128xbf16>,
    %c0_50 = arith.constant 0 : index
    %c130_51 = arith.constant 130 : index
    %46 = vector.load %arg7[%c0_50, %c130_51] : memref<8x384xbf16, #tpu.memory_space<vmem>>, vector<8x128xbf16>
    %c24_52 = arith.constant 24 : index
    %c0_53 = arith.constant 0 : index
    %47 = vector.load %arg8[%c24_52, %c0_53] : memref<36x128xbf16, #tpu.memory_space<vmem>>, vector<8x128xbf16>
    tpu.vector_store %arg8[%c24_52, %c0_53], %46 {strides = array<i32>} : memref<36x128xbf16, #tpu.memory_space<vmem>>, vector<8x128xbf16>,
    %c0_54 = arith.constant 0 : index
    %c0_55 = arith.constant 0 : index
    %48 = vector.load %arg4[%c0_54, %c0_55] : memref<8x32xbf16, #tpu.memory_space<vmem>>, vector<8x32xbf16>
    %c0_56 = arith.constant 0 : index
    %c0_57 = arith.constant 0 : index
    %49 = vector.load %arg8[%c0_56, %c0_57] : memref<36x128xbf16, #tpu.memory_space<vmem>>, vector<32x128xbf16>
    %cst_58 = arith.constant dense<0.000000e+00> : vector<8x128xf32>
    %50 = tpu.matmul %48, %49, %cst_58 {dimension_numbers = #tpu.dot_dimension_numbers<[1], [0], [0], [1], [0, 0, 1, 1], [], []>} : vector<8x32xbf16>, vector<32x128xbf16>, vector<8x128xf32> -> vector<8x128xf32>
    %cst_59 = arith.constant 0.000000e+00 : f32
    %51 = vector.shape_cast %2 : vector<1x128xi1> to vector<1x128xi1>
    %52 = vector.broadcast %51 : vector<1x128xi1> to vector<8x128xi1>
    %53 = vector.broadcast %cst_59 : f32 to vector<8x128xf32>
    %54 = arith.select %52, %50, %53 : vector<8x128xi1>, vector<8x128xf32>
    %55 = arith.truncf %54 : vector<8x128xf32> to vector<8x128xbf16>
    %c0_60 = arith.constant 0 : index
    %c128_61 = arith.constant 128 : index
    %56 = vector.load %arg7[%c0_60, %c128_61] : memref<8x384xbf16, #tpu.memory_space<vmem>>, vector<8x128xbf16>
    tpu.vector_store %arg7[%c0_60, %c128_61], %55 {strides = array<i32>} : memref<8x384xbf16, #tpu.memory_space<vmem>>, vector<8x128xbf16>,
    %c0_62 = arith.constant 0 : index
    %c128_63 = arith.constant 128 : index
    %57 = vector.load %arg7[%c0_62, %c128_63] : memref<8x384xbf16, #tpu.memory_space<vmem>>, vector<8x128xbf16>
    %c0_64 = arith.constant 0 : index
    %c0_65 = arith.constant 0 : index
    %58 = vector.load %arg8[%c0_64, %c0_65] : memref<36x128xbf16, #tpu.memory_space<vmem>>, vector<8x128xbf16>
    tpu.vector_store %arg8[%c0_64, %c0_65], %57 {strides = array<i32>} : memref<36x128xbf16, #tpu.memory_space<vmem>>, vector<8x128xbf16>,
    %c0_66 = arith.constant 0 : index
    %c129_67 = arith.constant 129 : index
    %59 = vector.load %arg7[%c0_66, %c129_67] : memref<8x384xbf16, #tpu.memory_space<vmem>>, vector<8x128xbf16>
    %c8_68 = arith.constant 8 : index
    %c0_69 = arith.constant 0 : index
    %60 = vector.load %arg8[%c8_68, %c0_69] : memref<36x128xbf16, #tpu.memory_space<vmem>>, vector<8x128xbf16>
    tpu.vector_store %arg8[%c8_68, %c0_69], %59 {strides = array<i32>} : memref<36x128xbf16, #tpu.memory_space<vmem>>, vector<8x128xbf16>,
    %c0_70 = arith.constant 0 : index
    %c0_71 = arith.constant 0 : index
    %61 = vector.load %arg5[%c0_70, %c0_71] : memref<8x16xbf16, #tpu.memory_space<vmem>>, vector<8x16xbf16>
    %c0_72 = arith.constant 0 : index
    %c0_73 = arith.constant 0 : index
    %62 = vector.load %arg8[%c0_72, %c0_73] : memref<36x128xbf16, #tpu.memory_space<vmem>>, vector<16x128xbf16>
    %cst_74 = arith.constant dense<0.000000e+00> : vector<8x128xf32>
    %63 = tpu.matmul %61, %62, %cst_74 {dimension_numbers = #tpu.dot_dimension_numbers<[1], [0], [0], [1], [0, 0, 1, 1], [], []>} : vector<8x16xbf16>, vector<16x128xbf16>, vector<8x128xf32> -> vector<8x128xf32>
    %cst_75 = arith.constant 0.000000e+00 : f32
    %64 = vector.shape_cast %2 : vector<1x128xi1> to vector<1x128xi1>
    %65 = vector.broadcast %64 : vector<1x128xi1> to vector<8x128xi1>
    %66 = vector.broadcast %cst_75 : f32 to vector<8x128xf32>
    %67 = arith.select %65, %63, %66 : vector<8x128xi1>, vector<8x128xf32>
    %68 = arith.truncf %67 : vector<8x128xf32> to vector<8x128xbf16>
    %c0_76 = arith.constant 0 : index
    %c0_77 = arith.constant 0 : index
    %c0_78 = arith.constant 0 : index
    %69 = vector.load %arg6[%c0_76, %c0_77, %c0_78] : memref<1x8x128xbf16, #tpu.memory_space<vmem>>, vector<1x8x128xbf16>
    %70 = vector.shape_cast %69 : vector<1x8x128xbf16> to vector<8x128xbf16>
    %71 = vector.shape_cast %68 : vector<8x128xbf16> to vector<1x8x128xbf16>
    tpu.vector_store %arg6[%c0_76, %c0_77, %c0_78], %71 {strides = array<i32>} : memref<1x8x128xbf16, #tpu.memory_space<vmem>>, vector<1x8x128xbf16>,
    return
  }
  func.func @transform_0(%arg0: i32) -> (i32, i32, i32) {
    %c0_i32 = arith.constant 0 : i32
    %c0_i32_0 = arith.constant 0 : i32
    %c0_i32_1 = arith.constant 0 : i32
    return %arg0, %c0_i32, %c0_i32_0 : i32, i32, i32
  }
  func.func @transform_1(%arg0: i32) -> (i32, i32) {
    %c0_i32 = arith.constant 0 : i32
    %c0_i32_0 = arith.constant 0 : i32
    %c0_i32_1 = arith.constant 0 : i32
    return %c0_i32, %c0_i32_0 : i32, i32
  }
  func.func @transform_2(%arg0: i32) -> (i32, i32) {
    %c0_i32 = arith.constant 0 : i32
    %c0_i32_0 = arith.constant 0 : i32
    %c0_i32_1 = arith.constant 0 : i32
    return %c0_i32, %c0_i32_0 : i32, i32
  }
  func.func @transform_3(%arg0: i32) -> (i32, i32) {
    %c0_i32 = arith.constant 0 : i32
    %c0_i32_0 = arith.constant 0 : i32
    %c0_i32_1 = arith.constant 0 : i32
    return %c0_i32, %c0_i32_0 : i32, i32
  }
  func.func @transform_4(%arg0: i32) -> (i32, i32) {
    %c0_i32 = arith.constant 0 : i32
    %c0_i32_0 = arith.constant 0 : i32
    %c0_i32_1 = arith.constant 0 : i32
    return %c0_i32, %c0_i32_0 : i32, i32
  }
  func.func @transform_5(%arg0: i32) -> (i32, i32, i32) {
    %c0_i32 = arith.constant 0 : i32
    %c0_i32_0 = arith.constant 0 : i32
    %c0_i32_1 = arith.constant 0 : i32
    return %arg0, %c0_i32, %c0_i32_0 : i32, i32, i32
  }
}

module attributes {stable_mosaic.version = 11 : i64} {
  func.func @kernel(%arg0: i32, %arg1: memref<1x4x128xbf16, #tpu.memory_space<vmem>>, %arg2: memref<4x4xbf16, #tpu.memory_space<vmem>>, %arg3: memref<8x36xbf16, #tpu.memory_space<vmem>>, %arg4: memref<8x32xbf16, #tpu.memory_space<vmem>>, %arg5: memref<8x16xbf16, #tpu.memory_space<vmem>>, %arg6: memref<1x8x128xbf16, #tpu.memory_space<vmem>>, %arg7: memref<8x384xbf16, #tpu.memory_space<vmem>>, %arg8: memref<36x128xbf16, #tpu.memory_space<vmem>>) attributes {dimension_semantics = [#tpu.dimension_semantics<parallel>], iteration_bounds = array<i64: 2>, scalar_prefetch = 0 : i64, scratch_operands = 2 : i64, tpu.core_type = #tpu.core_type<tc>, window_params = [{transform_indices = @transform_0, window_bounds = array<i64: 1, 4, 128>}, {pipeline_mode = #tpu.pipeline_mode<synchronous>, transform_indices = @transform_1, window_bounds = array<i64: 4, 4>}, {pipeline_mode = #tpu.pipeline_mode<synchronous>, transform_indices = @transform_2, window_bounds = array<i64: 8, 36>}, {pipeline_mode = #tpu.pipeline_mode<synchronous>, transform_indices = @transform_3, window_bounds = array<i64: 8, 32>}, {pipeline_mode = #tpu.pipeline_mode<synchronous>, transform_indices = @transform_4, window_bounds = array<i64: 8, 16>}, {transform_indices = @transform_5, window_bounds = array<i64: 1, 8, 128>}]} {
    %0 = tpu.iota {dimensions = array<i32: 1>} : vector<1x128xi32>
    %c16_i32 = arith.constant 16 : i32
    %1 = vector.broadcast %c16_i32 : i32 to vector<1x128xi32>
    %2 = arith.cmpi slt, %0, %1 : vector<1x128xi32>
    %cst = arith.constant 0.000000e+00 : bf16
    %3 = vector.broadcast %cst : bf16 to vector<8x128xbf16>
    %c0 = arith.constant 0 : index
    %c0_0 = arith.constant 0 : index
    %4 = vector.load %arg7[%c0, %c0_0] : memref<8x384xbf16, #tpu.memory_space<vmem>>, vector<8x128xbf16>
    tpu.vector_store %arg7[%c0, %c0_0], %3 {strides = array<i32>} : memref<8x384xbf16, #tpu.memory_space<vmem>>, vector<8x128xbf16>,
    %cst_1 = arith.constant 0.000000e+00 : bf16
    %5 = vector.broadcast %cst_1 : bf16 to vector<8x128xbf16>
    %c0_2 = arith.constant 0 : index
    %c256 = arith.constant 256 : index
    %6 = vector.load %arg7[%c0_2, %c256] : memref<8x384xbf16, #tpu.memory_space<vmem>>, vector<8x128xbf16>
    tpu.vector_store %arg7[%c0_2, %c256], %5 {strides = array<i32>} : memref<8x384xbf16, #tpu.memory_space<vmem>>, vector<8x128xbf16>,
    %c0_3 = arith.constant 0 : index
    %c0_4 = arith.constant 0 : index
    %c0_5 = arith.constant 0 : index
    %7 = vector.load %arg1[%c0_3, %c0_4, %c0_5] : memref<1x4x128xbf16, #tpu.memory_space<vmem>>, vector<1x4x128xbf16>
    %8 = vector.shape_cast %7 : vector<1x4x128xbf16> to vector<4x128xbf16>
    %c0_6 = arith.constant 0 : index
    %c0_7 = arith.constant 0 : index
    %9 = vector.load %arg2[%c0_6, %c0_7] : memref<4x4xbf16, #tpu.memory_space<vmem>>, vector<4x4xbf16>
    %cst_8 = arith.constant dense<0.000000e+00> : vector<4x128xf32>
    %10 = tpu.matmul %9, %8, %cst_8 {dimension_numbers = #tpu.dot_dimension_numbers<[1], [0], [0], [1], [0, 0, 1, 1], [], []>} : vector<4x4xbf16>, vector<4x128xbf16>, vector<4x128xf32> -> vector<4x128xf32>
    %11 = arith.truncf %10 : vector<4x128xf32> to vector<4x128xbf16>
    %c0_9 = arith.constant 0 : index
    %c128 = arith.constant 128 : index
    %12 = vector.load %arg7[%c0_9, %c128] : memref<8x384xbf16, #tpu.memory_space<vmem>>, vector<4x128xbf16>
    tpu.vector_store %arg7[%c0_9, %c128], %11 {strides = array<i32>} : memref<8x384xbf16, #tpu.memory_space<vmem>>, vector<4x128xbf16>,
    %c0_10 = arith.constant 0 : index
    %c124 = arith.constant 124 : index
    %13 = vector.load %arg7[%c0_10, %c124] : memref<8x384xbf16, #tpu.memory_space<vmem>>, vector<4x128xbf16>
    %c0_11 = arith.constant 0 : index
    %c0_12 = arith.constant 0 : index
    %14 = vector.load %arg8[%c0_11, %c0_12] : memref<36x128xbf16, #tpu.memory_space<vmem>>, vector<4x128xbf16>
    tpu.vector_store %arg8[%c0_11, %c0_12], %13 {strides = array<i32>} : memref<36x128xbf16, #tpu.memory_space<vmem>>, vector<4x128xbf16>,
    %c0_13 = arith.constant 0 : index
    %c125 = arith.constant 125 : index
    %15 = vector.load %arg7[%c0_13, %c125] : memref<8x384xbf16, #tpu.memory_space<vmem>>, vector<4x128xbf16>
    %c4 = arith.constant 4 : index
    %c0_14 = arith.constant 0 : index
    %16 = vector.load %arg8[%c4, %c0_14] : memref<36x128xbf16, #tpu.memory_space<vmem>>, vector<4x128xbf16>
    tpu.vector_store %arg8[%c4, %c0_14], %15 {strides = array<i32>} : memref<36x128xbf16, #tpu.memory_space<vmem>>, vector<4x128xbf16>,
    %c0_15 = arith.constant 0 : index
    %c126 = arith.constant 126 : index
    %17 = vector.load %arg7[%c0_15, %c126] : memref<8x384xbf16, #tpu.memory_space<vmem>>, vector<4x128xbf16>
    %c8 = arith.constant 8 : index
    %c0_16 = arith.constant 0 : index
    %18 = vector.load %arg8[%c8, %c0_16] : memref<36x128xbf16, #tpu.memory_space<vmem>>, vector<4x128xbf16>
    tpu.vector_store %arg8[%c8, %c0_16], %17 {strides = array<i32>} : memref<36x128xbf16, #tpu.memory_space<vmem>>, vector<4x128xbf16>,
    %c0_17 = arith.constant 0 : index
    %c127 = arith.constant 127 : index
    %19 = vector.load %arg7[%c0_17, %c127] : memref<8x384xbf16, #tpu.memory_space<vmem>>, vector<4x128xbf16>
    %c12 = arith.constant 12 : index
    %c0_18 = arith.constant 0 : index
    %20 = vector.load %arg8[%c12, %c0_18] : memref<36x128xbf16, #tpu.memory_space<vmem>>, vector<4x128xbf16>
    tpu.vector_store %arg8[%c12, %c0_18], %19 {strides = array<i32>} : memref<36x128xbf16, #tpu.memory_space<vmem>>, vector<4x128xbf16>,
    %c0_19 = arith.constant 0 : index
    %c128_20 = arith.constant 128 : index
    %21 = vector.load %arg7[%c0_19, %c128_20] : memref<8x384xbf16, #tpu.memory_space<vmem>>, vector<4x128xbf16>
    %c16 = arith.constant 16 : index
    %c0_21 = arith.constant 0 : index
    %22 = vector.load %arg8[%c16, %c0_21] : memref<36x128xbf16, #tpu.memory_space<vmem>>, vector<4x128xbf16>
    tpu.vector_store %arg8[%c16, %c0_21], %21 {strides = array<i32>} : memref<36x128xbf16, #tpu.memory_space<vmem>>, vector<4x128xbf16>,
    %c0_22 = arith.constant 0 : index
    %c129 = arith.constant 129 : index
    %23 = vector.load %arg7[%c0_22, %c129] : memref<8x384xbf16, #tpu.memory_space<vmem>>, vector<4x128xbf16>
    %c20 = arith.constant 20 : index
    %c0_23 = arith.constant 0 : index
    %24 = vector.load %arg8[%c20, %c0_23] : memref<36x128xbf16, #tpu.memory_space<vmem>>, vector<4x128xbf16>
    tpu.vector_store %arg8[%c20, %c0_23], %23 {strides = array<i32>} : memref<36x128xbf16, #tpu.memory_space<vmem>>, vector<4x128xbf16>,
    %c0_24 = arith.constant 0 : index
    %c130 = arith.constant 130 : index
    %25 = vector.load %arg7[%c0_24, %c130] : memref<8x384xbf16, #tpu.memory_space<vmem>>, vector<4x128xbf16>
    %c24 = arith.constant 24 : index
    %c0_25 = arith.constant 0 : index
    %26 = vector.load %arg8[%c24, %c0_25] : memref<36x128xbf16, #tpu.memory_space<vmem>>, vector<4x128xbf16>
    tpu.vector_store %arg8[%c24, %c0_25], %25 {strides = array<i32>} : memref<36x128xbf16, #tpu.memory_space<vmem>>, vector<4x128xbf16>,
    %c0_26 = arith.constant 0 : index
    %c131 = arith.constant 131 : index
    %27 = vector.load %arg7[%c0_26, %c131] : memref<8x384xbf16, #tpu.memory_space<vmem>>, vector<4x128xbf16>
    %c28 = arith.constant 28 : index
    %c0_27 = arith.constant 0 : index
    %28 = vector.load %arg8[%c28, %c0_27] : memref<36x128xbf16, #tpu.memory_space<vmem>>, vector<4x128xbf16>
    tpu.vector_store %arg8[%c28, %c0_27], %27 {strides = array<i32>} : memref<36x128xbf16, #tpu.memory_space<vmem>>, vector<4x128xbf16>,
    %c0_28 = arith.constant 0 : index
    %c132 = arith.constant 132 : index
    %29 = vector.load %arg7[%c0_28, %c132] : memref<8x384xbf16, #tpu.memory_space<vmem>>, vector<4x128xbf16>
    %c32 = arith.constant 32 : index
    %c0_29 = arith.constant 0 : index
    %30 = vector.load %arg8[%c32, %c0_29] : memref<36x128xbf16, #tpu.memory_space<vmem>>, vector<4x128xbf16>
    tpu.vector_store %arg8[%c32, %c0_29], %29 {strides = array<i32>} : memref<36x128xbf16, #tpu.memory_space<vmem>>, vector<4x128xbf16>,
    %c0_30 = arith.constant 0 : index
    %c0_31 = arith.constant 0 : index
    %31 = vector.load %arg3[%c0_30, %c0_31] : memref<8x36xbf16, #tpu.memory_space<vmem>>, vector<8x36xbf16>
    %c0_32 = arith.constant 0 : index
    %c0_33 = arith.constant 0 : index
    %32 = vector.load %arg8[%c0_32, %c0_33] : memref<36x128xbf16, #tpu.memory_space<vmem>>, vector<36x128xbf16>
    %cst_34 = arith.constant dense<0.000000e+00> : vector<8x128xf32>
    %33 = tpu.matmul %31, %32, %cst_34 {dimension_numbers = #tpu.dot_dimension_numbers<[1], [0], [0], [1], [0, 0, 1, 1], [], []>} : vector<8x36xbf16>, vector<36x128xbf16>, vector<8x128xf32> -> vector<8x128xf32>
    %cst_35 = arith.constant 0.000000e+00 : f32
    %34 = vector.shape_cast %2 : vector<1x128xi1> to vector<1x128xi1>
    %35 = vector.broadcast %34 : vector<1x128xi1> to vector<8x128xi1>
    %36 = vector.broadcast %cst_35 : f32 to vector<8x128xf32>
    %37 = arith.select %35, %33, %36 : vector<8x128xi1>, vector<8x128xf32>
    %38 = arith.truncf %37 : vector<8x128xf32> to vector<8x128xbf16>
    %c0_36 = arith.constant 0 : index
    %c128_37 = arith.constant 128 : index
    %39 = vector.load %arg7[%c0_36, %c128_37] : memref<8x384xbf16, #tpu.memory_space<vmem>>, vector<8x128xbf16>
    tpu.vector_store %arg7[%c0_36, %c128_37], %38 {strides = array<i32>} : memref<8x384xbf16, #tpu.memory_space<vmem>>, vector<8x128xbf16>,
    %c0_38 = arith.constant 0 : index
    %c127_39 = arith.constant 127 : index
    %40 = vector.load %arg7[%c0_38, %c127_39] : memref<8x384xbf16, #tpu.memory_space<vmem>>, vector<8x128xbf16>
    %c0_40 = arith.constant 0 : index
    %c0_41 = arith.constant 0 : index
    %41 = vector.load %arg8[%c0_40, %c0_41] : memref<36x128xbf16, #tpu.memory_space<vmem>>, vector<8x128xbf16>
    tpu.vector_store %arg8[%c0_40, %c0_41], %40 {strides = array<i32>} : memref<36x128xbf16, #tpu.memory_space<vmem>>, vector<8x128xbf16>,
    %c0_42 = arith.constant 0 : index
    %c128_43 = arith.constant 128 : index
    %42 = vector.load %arg7[%c0_42, %c128_43] : memref<8x384xbf16, #tpu.memory_space<vmem>>, vector<8x128xbf16>
    %c8_44 = arith.constant 8 : index
    %c0_45 = arith.constant 0 : index
    %43 = vector.load %arg8[%c8_44, %c0_45] : memref<36x128xbf16, #tpu.memory_space<vmem>>, vector<8x128xbf16>
    tpu.vector_store %arg8[%c8_44, %c0_45], %42 {strides = array<i32>} : memref<36x128xbf16, #tpu.memory_space<vmem>>, vector<8x128xbf16>,
    %c0_46 = arith.constant 0 : index
    %c129_47 = arith.constant 129 : index
    %44 = vector.load %arg7[%c0_46, %c129_47] : memref<8x384xbf16, #tpu.memory_space<vmem>>, vector<8x128xbf16>
    %c16_48 = arith.constant 16 : index
    %c0_49 = arith.constant 0 : index
    %45 = vector.load %arg8[%c16_48, %c0_49] : memref<36x128xbf16, #tpu.memory_space<vmem>>, vector<8x128xbf16>
    tpu.vector_store %arg8[%c16_48, %c0_49], %44 {strides = array<i32>} : memref<36x128xbf16, #tpu.memory_space<vmem>>, vector<8x128xbf16>,
    %c0_50 = arith.constant 0 : index
    %c130_51 = arith.constant 130 : index
    %46 = vector.load %arg7[%c0_50, %c130_51] : memref<8x384xbf16, #tpu.memory_space<vmem>>, vector<8x128xbf16>
    %c24_52 = arith.constant 24 : index
    %c0_53 = arith.constant 0 : index
    %47 = vector.load %arg8[%c24_52, %c0_53] : memref<36x128xbf16, #tpu.memory_space<vmem>>, vector<8x128xbf16>
    tpu.vector_store %arg8[%c24_52, %c0_53], %46 {strides = array<i32>} : memref<36x128xbf16, #tpu.memory_space<vmem>>, vector<8x128xbf16>,
    %c0_54 = arith.constant 0 : index
    %c0_55 = arith.constant 0 : index
    %48 = vector.load %arg4[%c0_54, %c0_55] : memref<8x32xbf16, #tpu.memory_space<vmem>>, vector<8x32xbf16>
    %c0_56 = arith.constant 0 : index
    %c0_57 = arith.constant 0 : index
    %49 = vector.load %arg8[%c0_56, %c0_57] : memref<36x128xbf16, #tpu.memory_space<vmem>>, vector<32x128xbf16>
    %cst_58 = arith.constant dense<0.000000e+00> : vector<8x128xf32>
    %50 = tpu.matmul %48, %49, %cst_58 {dimension_numbers = #tpu.dot_dimension_numbers<[1], [0], [0], [1], [0, 0, 1, 1], [], []>} : vector<8x32xbf16>, vector<32x128xbf16>, vector<8x128xf32> -> vector<8x128xf32>
    %cst_59 = arith.constant 0.000000e+00 : f32
    %51 = vector.shape_cast %2 : vector<1x128xi1> to vector<1x128xi1>
    %52 = vector.broadcast %51 : vector<1x128xi1> to vector<8x128xi1>
    %53 = vector.broadcast %cst_59 : f32 to vector<8x128xf32>
    %54 = arith.select %52, %50, %53 : vector<8x128xi1>, vector<8x128xf32>
    %55 = arith.truncf %54 : vector<8x128xf32> to vector<8x128xbf16>
    %c0_60 = arith.constant 0 : index
    %c128_61 = arith.constant 128 : index
    %56 = vector.load %arg7[%c0_60, %c128_61] : memref<8x384xbf16, #tpu.memory_space<vmem>>, vector<8x128xbf16>
    tpu.vector_store %arg7[%c0_60, %c128_61], %55 {strides = array<i32>} : memref<8x384xbf16, #tpu.memory_space<vmem>>, vector<8x128xbf16>,
    %c0_62 = arith.constant 0 : index
    %c128_63 = arith.constant 128 : index
    %57 = vector.load %arg7[%c0_62, %c128_63] : memref<8x384xbf16, #tpu.memory_space<vmem>>, vector<8x128xbf16>
    %c0_64 = arith.constant 0 : index
    %c0_65 = arith.constant 0 : index
    %58 = vector.load %arg8[%c0_64, %c0_65] : memref<36x128xbf16, #tpu.memory_space<vmem>>, vector<8x128xbf16>
    tpu.vector_store %arg8[%c0_64, %c0_65], %57 {strides = array<i32>} : memref<36x128xbf16, #tpu.memory_space<vmem>>, vector<8x128xbf16>,
    %c0_66 = arith.constant 0 : index
    %c129_67 = arith.constant 129 : index
    %59 = vector.load %arg7[%c0_66, %c129_67] : memref<8x384xbf16, #tpu.memory_space<vmem>>, vector<8x128xbf16>
    %c8_68 = arith.constant 8 : index
    %c0_69 = arith.constant 0 : index
    %60 = vector.load %arg8[%c8_68, %c0_69] : memref<36x128xbf16, #tpu.memory_space<vmem>>, vector<8x128xbf16>
    tpu.vector_store %arg8[%c8_68, %c0_69], %59 {strides = array<i32>} : memref<36x128xbf16, #tpu.memory_space<vmem>>, vector<8x128xbf16>,
    %c0_70 = arith.constant 0 : index
    %c0_71 = arith.constant 0 : index
    %61 = vector.load %arg5[%c0_70, %c0_71] : memref<8x16xbf16, #tpu.memory_space<vmem>>, vector<8x16xbf16>
    %c0_72 = arith.constant 0 : index
    %c0_73 = arith.constant 0 : index
    %62 = vector.load %arg8[%c0_72, %c0_73] : memref<36x128xbf16, #tpu.memory_space<vmem>>, vector<16x128xbf16>
    %cst_74 = arith.constant dense<0.000000e+00> : vector<8x128xf32>
    %63 = tpu.matmul %61, %62, %cst_74 {dimension_numbers = #tpu.dot_dimension_numbers<[1], [0], [0], [1], [0, 0, 1, 1], [], []>} : vector<8x16xbf16>, vector<16x128xbf16>, vector<8x128xf32> -> vector<8x128xf32>
    %cst_75 = arith.constant 0.000000e+00 : f32
    %64 = vector.shape_cast %2 : vector<1x128xi1> to vector<1x128xi1>
    %65 = vector.broadcast %64 : vector<1x128xi1> to vector<8x128xi1>
    %66 = vector.broadcast %cst_75 : f32 to vector<8x128xf32>
    %67 = arith.select %65, %63, %66 : vector<8x128xi1>, vector<8x128xf32>
    %68 = arith.truncf %67 : vector<8x128xf32> to vector<8x128xbf16>
    %c0_76 = arith.constant 0 : index
    %c0_77 = arith.constant 0 : index
    %c0_78 = arith.constant 0 : index
    %69 = vector.load %arg6[%c0_76, %c0_77, %c0_78] : memref<1x8x128xbf16, #tpu.memory_space<vmem>>, vector<1x8x128xbf16>
    %70 = vector.shape_cast %69 : vector<1x8x128xbf16> to vector<8x128xbf16>
    %71 = vector.shape_cast %68 : vector<8x128xbf16> to vector<1x8x128xbf16>
    tpu.vector_store %arg6[%c0_76, %c0_77, %c0_78], %71 {strides = array<i32>} : memref<1x8x128xbf16, #tpu.memory_space<vmem>>, vector<1x8x128xbf16>,
    return
  }
  func.func @transform_0(%arg0: i32) -> (i32, i32, i32) {
    %c0_i32 = arith.constant 0 : i32
    %c0_i32_0 = arith.constant 0 : i32
    %c0_i32_1 = arith.constant 0 : i32
    return %arg0, %c0_i32, %c0_i32_0 : i32, i32, i32
  }
  func.func @transform_1(%arg0: i32) -> (i32, i32) {
    %c0_i32 = arith.constant 0 : i32
    %c0_i32_0 = arith.constant 0 : i32
    %c0_i32_1 = arith.constant 0 : i32
    return %c0_i32, %c0_i32_0 : i32, i32
  }
  func.func @transform_2(%arg0: i32) -> (i32, i32) {
    %c0_i32 = arith.constant 0 : i32
    %c0_i32_0 = arith.constant 0 : i32
    %c0_i32_1 = arith.constant 0 : i32
    return %c0_i32, %c0_i32_0 : i32, i32
  }
  func.func @transform_3(%arg0: i32) -> (i32, i32) {
    %c0_i32 = arith.constant 0 : i32
    %c0_i32_0 = arith.constant 0 : i32
    %c0_i32_1 = arith.constant 0 : i32
    return %c0_i32, %c0_i32_0 : i32, i32
  }
  func.func @transform_4(%arg0: i32) -> (i32, i32) {
    %c0_i32 = arith.constant 0 : i32
    %c0_i32_0 = arith.constant 0 : i32
    %c0_i32_1 = arith.constant 0 : i32
    return %c0_i32, %c0_i32_0 : i32, i32
  }
  func.func @transform_5(%arg0: i32) -> (i32, i32, i32) {
    %c0_i32 = arith.constant 0 : i32
    %c0_i32_0 = arith.constant 0 : i32
    %c0_i32_1 = arith.constant 0 : i32
    return %arg0, %c0_i32, %c0_i32_0 : i32, i32, i32
  }
}

module attributes {stable_mosaic.version = 11 : i64} {
  func.func @kernel(%arg0: i32, %arg1: memref<1x8x128xbf16, #tpu.memory_space<vmem>>, %arg2: memref<4x8xbf16, #tpu.memory_space<vmem>>, %arg3: memref<8x36xbf16, #tpu.memory_space<vmem>>, %arg4: memref<8x32xbf16, #tpu.memory_space<vmem>>, %arg5: memref<8x16xbf16, #tpu.memory_space<vmem>>, %arg6: memref<8x8xbf16, #tpu.memory_space<vmem>>, %arg7: memref<1x8x128xbf16, #tpu.memory_space<vmem>>, %arg8: memref<1x8x128xbf16, #tpu.memory_space<vmem>>, %arg9: memref<1x8x1xf32, #tpu.memory_space<vmem>>, %arg10: memref<1x8x1xf32, #tpu.memory_space<vmem>>, %arg11: memref<8x384xbf16, #tpu.memory_space<vmem>>, %arg12: memref<36x128xbf16, #tpu.memory_space<vmem>>) attributes {dimension_semantics = [#tpu.dimension_semantics<parallel>], iteration_bounds = array<i64: 2>, scalar_prefetch = 0 : i64, scratch_operands = 2 : i64, tpu.core_type = #tpu.core_type<tc>, window_params = [{transform_indices = @transform_0, window_bounds = array<i64: 1, 8, 128>}, {pipeline_mode = #tpu.pipeline_mode<synchronous>, transform_indices = @transform_1, window_bounds = array<i64: 4, 8>}, {pipeline_mode = #tpu.pipeline_mode<synchronous>, transform_indices = @transform_2, window_bounds = array<i64: 8, 36>}, {pipeline_mode = #tpu.pipeline_mode<synchronous>, transform_indices = @transform_3, window_bounds = array<i64: 8, 32>}, {pipeline_mode = #tpu.pipeline_mode<synchronous>, transform_indices = @transform_4, window_bounds = array<i64: 8, 16>}, {pipeline_mode = #tpu.pipeline_mode<synchronous>, transform_indices = @transform_5, window_bounds = array<i64: 8, 8>}, {transform_indices = @transform_6, window_bounds = array<i64: 1, 8, 128>}, {transform_indices = @transform_7, window_bounds = array<i64: 1, 8, 128>}, {transform_indices = @transform_8, window_bounds = array<i64: 1, 8, 1>}, {transform_indices = @transform_9, window_bounds = array<i64: 1, 8, 1>}]} {
    %0 = tpu.iota {dimensions = array<i32: 1>} : vector<1x128xi32>
    %c16_i32 = arith.constant 16 : i32
    %1 = vector.broadcast %c16_i32 : i32 to vector<1x128xi32>
    %2 = arith.cmpi slt, %0, %1 : vector<1x128xi32>
    %cst = arith.constant 0.000000e+00 : bf16
    %3 = vector.broadcast %cst : bf16 to vector<8x128xbf16>
    %c0 = arith.constant 0 : index
    %c0_0 = arith.constant 0 : index
    %4 = vector.load %arg11[%c0, %c0_0] : memref<8x384xbf16, #tpu.memory_space<vmem>>, vector<8x128xbf16>
    tpu.vector_store %arg11[%c0, %c0_0], %3 {strides = array<i32>} : memref<8x384xbf16, #tpu.memory_space<vmem>>, vector<8x128xbf16>,
    %cst_1 = arith.constant 0.000000e+00 : bf16
    %5 = vector.broadcast %cst_1 : bf16 to vector<8x128xbf16>
    %c0_2 = arith.constant 0 : index
    %c256 = arith.constant 256 : index
    %6 = vector.load %arg11[%c0_2, %c256] : memref<8x384xbf16, #tpu.memory_space<vmem>>, vector<8x128xbf16>
    tpu.vector_store %arg11[%c0_2, %c256], %5 {strides = array<i32>} : memref<8x384xbf16, #tpu.memory_space<vmem>>, vector<8x128xbf16>,
    %c0_3 = arith.constant 0 : index
    %c0_4 = arith.constant 0 : index
    %c0_5 = arith.constant 0 : index
    %7 = vector.load %arg1[%c0_3, %c0_4, %c0_5] : memref<1x8x128xbf16, #tpu.memory_space<vmem>>, vector<1x8x128xbf16>
    %8 = vector.shape_cast %7 : vector<1x8x128xbf16> to vector<8x128xbf16>
    %c0_6 = arith.constant 0 : index
    %c0_7 = arith.constant 0 : index
    %9 = vector.load %arg2[%c0_6, %c0_7] : memref<4x8xbf16, #tpu.memory_space<vmem>>, vector<4x8xbf16>
    %cst_8 = arith.constant dense<0.000000e+00> : vector<4x128xf32>
    %10 = tpu.matmul %9, %8, %cst_8 {dimension_numbers = #tpu.dot_dimension_numbers<[1], [0], [0], [1], [0, 0, 1, 1], [], []>} : vector<4x8xbf16>, vector<8x128xbf16>, vector<4x128xf32> -> vector<4x128xf32>
    %11 = arith.truncf %10 : vector<4x128xf32> to vector<4x128xbf16>
    %c0_9 = arith.constant 0 : index
    %c128 = arith.constant 128 : index
    %12 = vector.load %arg11[%c0_9, %c128] : memref<8x384xbf16, #tpu.memory_space<vmem>>, vector<4x128xbf16>
    tpu.vector_store %arg11[%c0_9, %c128], %11 {strides = array<i32>} : memref<8x384xbf16, #tpu.memory_space<vmem>>, vector<4x128xbf16>,
    %c0_10 = arith.constant 0 : index
    %c124 = arith.constant 124 : index
    %13 = vector.load %arg11[%c0_10, %c124] : memref<8x384xbf16, #tpu.memory_space<vmem>>, vector<4x128xbf16>
    %c0_11 = arith.constant 0 : index
    %c0_12 = arith.constant 0 : index
    %14 = vector.load %arg12[%c0_11, %c0_12] : memref<36x128xbf16, #tpu.memory_space<vmem>>, vector<4x128xbf16>
    tpu.vector_store %arg12[%c0_11, %c0_12], %13 {strides = array<i32>} : memref<36x128xbf16, #tpu.memory_space<vmem>>, vector<4x128xbf16>,
    %c0_13 = arith.constant 0 : index
    %c125 = arith.constant 125 : index
    %15 = vector.load %arg11[%c0_13, %c125] : memref<8x384xbf16, #tpu.memory_space<vmem>>, vector<4x128xbf16>
    %c4 = arith.constant 4 : index
    %c0_14 = arith.constant 0 : index
    %16 = vector.load %arg12[%c4, %c0_14] : memref<36x128xbf16, #tpu.memory_space<vmem>>, vector<4x128xbf16>
    tpu.vector_store %arg12[%c4, %c0_14], %15 {strides = array<i32>} : memref<36x128xbf16, #tpu.memory_space<vmem>>, vector<4x128xbf16>,
    %c0_15 = arith.constant 0 : index
    %c126 = arith.constant 126 : index
    %17 = vector.load %arg11[%c0_15, %c126] : memref<8x384xbf16, #tpu.memory_space<vmem>>, vector<4x128xbf16>
    %c8 = arith.constant 8 : index
    %c0_16 = arith.constant 0 : index
    %18 = vector.load %arg12[%c8, %c0_16] : memref<36x128xbf16, #tpu.memory_space<vmem>>, vector<4x128xbf16>
    tpu.vector_store %arg12[%c8, %c0_16], %17 {strides = array<i32>} : memref<36x128xbf16, #tpu.memory_space<vmem>>, vector<4x128xbf16>,
    %c0_17 = arith.constant 0 : index
    %c127 = arith.constant 127 : index
    %19 = vector.load %arg11[%c0_17, %c127] : memref<8x384xbf16, #tpu.memory_space<vmem>>, vector<4x128xbf16>
    %c12 = arith.constant 12 : index
    %c0_18 = arith.constant 0 : index
    %20 = vector.load %arg12[%c12, %c0_18] : memref<36x128xbf16, #tpu.memory_space<vmem>>, vector<4x128xbf16>
    tpu.vector_store %arg12[%c12, %c0_18], %19 {strides = array<i32>} : memref<36x128xbf16, #tpu.memory_space<vmem>>, vector<4x128xbf16>,
    %c0_19 = arith.constant 0 : index
    %c128_20 = arith.constant 128 : index
    %21 = vector.load %arg11[%c0_19, %c128_20] : memref<8x384xbf16, #tpu.memory_space<vmem>>, vector<4x128xbf16>
    %c16 = arith.constant 16 : index
    %c0_21 = arith.constant 0 : index
    %22 = vector.load %arg12[%c16, %c0_21] : memref<36x128xbf16, #tpu.memory_space<vmem>>, vector<4x128xbf16>
    tpu.vector_store %arg12[%c16, %c0_21], %21 {strides = array<i32>} : memref<36x128xbf16, #tpu.memory_space<vmem>>, vector<4x128xbf16>,
    %c0_22 = arith.constant 0 : index
    %c129 = arith.constant 129 : index
    %23 = vector.load %arg11[%c0_22, %c129] : memref<8x384xbf16, #tpu.memory_space<vmem>>, vector<4x128xbf16>
    %c20 = arith.constant 20 : index
    %c0_23 = arith.constant 0 : index
    %24 = vector.load %arg12[%c20, %c0_23] : memref<36x128xbf16, #tpu.memory_space<vmem>>, vector<4x128xbf16>
    tpu.vector_store %arg12[%c20, %c0_23], %23 {strides = array<i32>} : memref<36x128xbf16, #tpu.memory_space<vmem>>, vector<4x128xbf16>,
    %c0_24 = arith.constant 0 : index
    %c130 = arith.constant 130 : index
    %25 = vector.load %arg11[%c0_24, %c130] : memref<8x384xbf16, #tpu.memory_space<vmem>>, vector<4x128xbf16>
    %c24 = arith.constant 24 : index
    %c0_25 = arith.constant 0 : index
    %26 = vector.load %arg12[%c24, %c0_25] : memref<36x128xbf16, #tpu.memory_space<vmem>>, vector<4x128xbf16>
    tpu.vector_store %arg12[%c24, %c0_25], %25 {strides = array<i32>} : memref<36x128xbf16, #tpu.memory_space<vmem>>, vector<4x128xbf16>,
    %c0_26 = arith.constant 0 : index
    %c131 = arith.constant 131 : index
    %27 = vector.load %arg11[%c0_26, %c131] : memref<8x384xbf16, #tpu.memory_space<vmem>>, vector<4x128xbf16>
    %c28 = arith.constant 28 : index
    %c0_27 = arith.constant 0 : index
    %28 = vector.load %arg12[%c28, %c0_27] : memref<36x128xbf16, #tpu.memory_space<vmem>>, vector<4x128xbf16>
    tpu.vector_store %arg12[%c28, %c0_27], %27 {strides = array<i32>} : memref<36x128xbf16, #tpu.memory_space<vmem>>, vector<4x128xbf16>,
    %c0_28 = arith.constant 0 : index
    %c132 = arith.constant 132 : index
    %29 = vector.load %arg11[%c0_28, %c132] : memref<8x384xbf16, #tpu.memory_space<vmem>>, vector<4x128xbf16>
    %c32 = arith.constant 32 : index
    %c0_29 = arith.constant 0 : index
    %30 = vector.load %arg12[%c32, %c0_29] : memref<36x128xbf16, #tpu.memory_space<vmem>>, vector<4x128xbf16>
    tpu.vector_store %arg12[%c32, %c0_29], %29 {strides = array<i32>} : memref<36x128xbf16, #tpu.memory_space<vmem>>, vector<4x128xbf16>,
    %c0_30 = arith.constant 0 : index
    %c0_31 = arith.constant 0 : index
    %31 = vector.load %arg3[%c0_30, %c0_31] : memref<8x36xbf16, #tpu.memory_space<vmem>>, vector<8x36xbf16>
    %c0_32 = arith.constant 0 : index
    %c0_33 = arith.constant 0 : index
    %32 = vector.load %arg12[%c0_32, %c0_33] : memref<36x128xbf16, #tpu.memory_space<vmem>>, vector<36x128xbf16>
    %cst_34 = arith.constant dense<0.000000e+00> : vector<8x128xf32>
    %33 = tpu.matmul %31, %32, %cst_34 {dimension_numbers = #tpu.dot_dimension_numbers<[1], [0], [0], [1], [0, 0, 1, 1], [], []>} : vector<8x36xbf16>, vector<36x128xbf16>, vector<8x128xf32> -> vector<8x128xf32>
    %cst_35 = arith.constant 0.000000e+00 : f32
    %34 = vector.shape_cast %2 : vector<1x128xi1> to vector<1x128xi1>
    %35 = vector.broadcast %34 : vector<1x128xi1> to vector<8x128xi1>
    %36 = vector.broadcast %cst_35 : f32 to vector<8x128xf32>
    %37 = arith.select %35, %33, %36 : vector<8x128xi1>, vector<8x128xf32>
    %38 = arith.truncf %37 : vector<8x128xf32> to vector<8x128xbf16>
    %c0_36 = arith.constant 0 : index
    %c128_37 = arith.constant 128 : index
    %39 = vector.load %arg11[%c0_36, %c128_37] : memref<8x384xbf16, #tpu.memory_space<vmem>>, vector<8x128xbf16>
    tpu.vector_store %arg11[%c0_36, %c128_37], %38 {strides = array<i32>} : memref<8x384xbf16, #tpu.memory_space<vmem>>, vector<8x128xbf16>,
    %c0_38 = arith.constant 0 : index
    %c127_39 = arith.constant 127 : index
    %40 = vector.load %arg11[%c0_38, %c127_39] : memref<8x384xbf16, #tpu.memory_space<vmem>>, vector<8x128xbf16>
    %c0_40 = arith.constant 0 : index
    %c0_41 = arith.constant 0 : index
    %41 = vector.load %arg12[%c0_40, %c0_41] : memref<36x128xbf16, #tpu.memory_space<vmem>>, vector<8x128xbf16>
    tpu.vector_store %arg12[%c0_40, %c0_41], %40 {strides = array<i32>} : memref<36x128xbf16, #tpu.memory_space<vmem>>, vector<8x128xbf16>,
    %c0_42 = arith.constant 0 : index
    %c128_43 = arith.constant 128 : index
    %42 = vector.load %arg11[%c0_42, %c128_43] : memref<8x384xbf16, #tpu.memory_space<vmem>>, vector<8x128xbf16>
    %c8_44 = arith.constant 8 : index
    %c0_45 = arith.constant 0 : index
    %43 = vector.load %arg12[%c8_44, %c0_45] : memref<36x128xbf16, #tpu.memory_space<vmem>>, vector<8x128xbf16>
    tpu.vector_store %arg12[%c8_44, %c0_45], %42 {strides = array<i32>} : memref<36x128xbf16, #tpu.memory_space<vmem>>, vector<8x128xbf16>,
    %c0_46 = arith.constant 0 : index
    %c129_47 = arith.constant 129 : index
    %44 = vector.load %arg11[%c0_46, %c129_47] : memref<8x384xbf16, #tpu.memory_space<vmem>>, vector<8x128xbf16>
    %c16_48 = arith.constant 16 : index
    %c0_49 = arith.constant 0 : index
    %45 = vector.load %arg12[%c16_48, %c0_49] : memref<36x128xbf16, #tpu.memory_space<vmem>>, vector<8x128xbf16>
    tpu.vector_store %arg12[%c16_48, %c0_49], %44 {strides = array<i32>} : memref<36x128xbf16, #tpu.memory_space<vmem>>, vector<8x128xbf16>,
    %c0_50 = arith.constant 0 : index
    %c130_51 = arith.constant 130 : index
    %46 = vector.load %arg11[%c0_50, %c130_51] : memref<8x384xbf16, #tpu.memory_space<vmem>>, vector<8x128xbf16>
    %c24_52 = arith.constant 24 : index
    %c0_53 = arith.constant 0 : index
    %47 = vector.load %arg12[%c24_52, %c0_53] : memref<36x128xbf16, #tpu.memory_space<vmem>>, vector<8x128xbf16>
    tpu.vector_store %arg12[%c24_52, %c0_53], %46 {strides = array<i32>} : memref<36x128xbf16, #tpu.memory_space<vmem>>, vector<8x128xbf16>,
    %c0_54 = arith.constant 0 : index
    %c0_55 = arith.constant 0 : index
    %48 = vector.load %arg4[%c0_54, %c0_55] : memref<8x32xbf16, #tpu.memory_space<vmem>>, vector<8x32xbf16>
    %c0_56 = arith.constant 0 : index
    %c0_57 = arith.constant 0 : index
    %49 = vector.load %arg12[%c0_56, %c0_57] : memref<36x128xbf16, #tpu.memory_space<vmem>>, vector<32x128xbf16>
    %cst_58 = arith.constant dense<0.000000e+00> : vector<8x128xf32>
    %50 = tpu.matmul %48, %49, %cst_58 {dimension_numbers = #tpu.dot_dimension_numbers<[1], [0], [0], [1], [0, 0, 1, 1], [], []>} : vector<8x32xbf16>, vector<32x128xbf16>, vector<8x128xf32> -> vector<8x128xf32>
    %cst_59 = arith.constant 0.000000e+00 : f32
    %51 = vector.shape_cast %2 : vector<1x128xi1> to vector<1x128xi1>
    %52 = vector.broadcast %51 : vector<1x128xi1> to vector<8x128xi1>
    %53 = vector.broadcast %cst_59 : f32 to vector<8x128xf32>
    %54 = arith.select %52, %50, %53 : vector<8x128xi1>, vector<8x128xf32>
    %55 = arith.truncf %54 : vector<8x128xf32> to vector<8x128xbf16>
    %c0_60 = arith.constant 0 : index
    %c128_61 = arith.constant 128 : index
    %56 = vector.load %arg11[%c0_60, %c128_61] : memref<8x384xbf16, #tpu.memory_space<vmem>>, vector<8x128xbf16>
    tpu.vector_store %arg11[%c0_60, %c128_61], %55 {strides = array<i32>} : memref<8x384xbf16, #tpu.memory_space<vmem>>, vector<8x128xbf16>,
    %c0_62 = arith.constant 0 : index
    %c128_63 = arith.constant 128 : index
    %57 = vector.load %arg11[%c0_62, %c128_63] : memref<8x384xbf16, #tpu.memory_space<vmem>>, vector<8x128xbf16>
    %c0_64 = arith.constant 0 : index
    %c0_65 = arith.constant 0 : index
    %58 = vector.load %arg12[%c0_64, %c0_65] : memref<36x128xbf16, #tpu.memory_space<vmem>>, vector<8x128xbf16>
    tpu.vector_store %arg12[%c0_64, %c0_65], %57 {strides = array<i32>} : memref<36x128xbf16, #tpu.memory_space<vmem>>, vector<8x128xbf16>,
    %c0_66 = arith.constant 0 : index
    %c129_67 = arith.constant 129 : index
    %59 = vector.load %arg11[%c0_66, %c129_67] : memref<8x384xbf16, #tpu.memory_space<vmem>>, vector<8x128xbf16>
    %c8_68 = arith.constant 8 : index
    %c0_69 = arith.constant 0 : index
    %60 = vector.load %arg12[%c8_68, %c0_69] : memref<36x128xbf16, #tpu.memory_space<vmem>>, vector<8x128xbf16>
    tpu.vector_store %arg12[%c8_68, %c0_69], %59 {strides = array<i32>} : memref<36x128xbf16, #tpu.memory_space<vmem>>, vector<8x128xbf16>,
    %c0_70 = arith.constant 0 : index
    %c0_71 = arith.constant 0 : index
    %61 = vector.load %arg5[%c0_70, %c0_71] : memref<8x16xbf16, #tpu.memory_space<vmem>>, vector<8x16xbf16>
    %c0_72 = arith.constant 0 : index
    %c0_73 = arith.constant 0 : index
    %62 = vector.load %arg12[%c0_72, %c0_73] : memref<36x128xbf16, #tpu.memory_space<vmem>>, vector<16x128xbf16>
    %cst_74 = arith.constant dense<0.000000e+00> : vector<8x128xf32>
    %63 = tpu.matmul %61, %62, %cst_74 {dimension_numbers = #tpu.dot_dimension_numbers<[1], [0], [0], [1], [0, 0, 1, 1], [], []>} : vector<8x16xbf16>, vector<16x128xbf16>, vector<8x128xf32> -> vector<8x128xf32>
    %cst_75 = arith.constant 0.000000e+00 : f32
    %64 = vector.shape_cast %2 : vector<1x128xi1> to vector<1x128xi1>
    %65 = vector.broadcast %64 : vector<1x128xi1> to vector<8x128xi1>
    %66 = vector.broadcast %cst_75 : f32 to vector<8x128xf32>
    %67 = arith.select %65, %63, %66 : vector<8x128xi1>, vector<8x128xf32>
    %68 = arith.truncf %67 : vector<8x128xf32> to vector<8x128xbf16>
    %c0_76 = arith.constant 0 : index
    %c0_77 = arith.constant 0 : index
    %c0_78 = arith.constant 0 : index
    %69 = vector.load %arg7[%c0_76, %c0_77, %c0_78] : memref<1x8x128xbf16, #tpu.memory_space<vmem>>, vector<1x8x128xbf16>
    %70 = vector.shape_cast %69 : vector<1x8x128xbf16> to vector<8x128xbf16>
    %71 = vector.shape_cast %68 : vector<8x128xbf16> to vector<1x8x128xbf16>
    tpu.vector_store %arg7[%c0_76, %c0_77, %c0_78], %71 {strides = array<i32>} : memref<1x8x128xbf16, #tpu.memory_space<vmem>>, vector<1x8x128xbf16>,
    %c0_79 = arith.constant 0 : index
    %c0_80 = arith.constant 0 : index
    %72 = vector.load %arg6[%c0_79, %c0_80] : memref<8x8xbf16, #tpu.memory_space<vmem>>, vector<8x8xbf16>
    %cst_81 = arith.constant dense<0.000000e+00> : vector<8x128xf32>
    %73 = tpu.matmul %72, %8, %cst_81 {dimension_numbers = #tpu.dot_dimension_numbers<[1], [0], [0], [1], [0, 0, 1, 1], [], []>} : vector<8x8xbf16>, vector<8x128xbf16>, vector<8x128xf32> -> vector<8x128xf32>
    %74 = arith.truncf %73 : vector<8x128xf32> to vector<8x128xbf16>
    %c0_82 = arith.constant 0 : index
    %c0_83 = arith.constant 0 : index
    %c0_84 = arith.constant 0 : index
    %75 = vector.load %arg8[%c0_82, %c0_83, %c0_84] : memref<1x8x128xbf16, #tpu.memory_space<vmem>>, vector<1x8x128xbf16>
    %76 = vector.shape_cast %75 : vector<1x8x128xbf16> to vector<8x128xbf16>
    %77 = vector.shape_cast %74 : vector<8x128xbf16> to vector<1x8x128xbf16>
    tpu.vector_store %arg8[%c0_82, %c0_83, %c0_84], %77 {strides = array<i32>} : memref<1x8x128xbf16, #tpu.memory_space<vmem>>, vector<1x8x128xbf16>,
    %cst_85 = arith.constant dense<0.000000e+00> : vector<8xf32>
    %78 = vector.multi_reduction <add>, %73, %cst_85 [1] : vector<8x128xf32> to vector<8xf32>
    %79 = vector.shape_cast %78 : vector<8xf32> to vector<8x1xf32>
    %c0_86 = arith.constant 0 : index
    %c0_87 = arith.constant 0 : index
    %c0_88 = arith.constant 0 : index
    %80 = vector.load %arg9[%c0_86, %c0_87, %c0_88] : memref<1x8x1xf32, #tpu.memory_space<vmem>>, vector<1x8x1xf32>
    %81 = vector.shape_cast %80 : vector<1x8x1xf32> to vector<8x1xf32>
    %82 = vector.shape_cast %79 : vector<8x1xf32> to vector<1x8x1xf32>
    tpu.vector_store %arg9[%c0_86, %c0_87, %c0_88], %82 {strides = array<i32>} : memref<1x8x1xf32, #tpu.memory_space<vmem>>, vector<1x8x1xf32>,
    %83 = arith.mulf %73, %73 : vector<8x128xf32>
    %cst_89 = arith.constant dense<0.000000e+00> : vector<8xf32>
    %84 = vector.multi_reduction <add>, %83, %cst_89 [1] : vector<8x128xf32> to vector<8xf32>
    %85 = vector.shape_cast %84 : vector<8xf32> to vector<8x1xf32>
    %c0_90 = arith.constant 0 : index
    %c0_91 = arith.constant 0 : index
    %c0_92 = arith.constant 0 : index
    %86 = vector.load %arg10[%c0_90, %c0_91, %c0_92] : memref<1x8x1xf32, #tpu.memory_space<vmem>>, vector<1x8x1xf32>
    %87 = vector.shape_cast %86 : vector<1x8x1xf32> to vector<8x1xf32>
    %88 = vector.shape_cast %85 : vector<8x1xf32> to vector<1x8x1xf32>
    tpu.vector_store %arg10[%c0_90, %c0_91, %c0_92], %88 {strides = array<i32>} : memref<1x8x1xf32, #tpu.memory_space<vmem>>, vector<1x8x1xf32>,
    return
  }
  func.func @transform_0(%arg0: i32) -> (i32, i32, i32) {
    %c0_i32 = arith.constant 0 : i32
    %c0_i32_0 = arith.constant 0 : i32
    %c0_i32_1 = arith.constant 0 : i32
    return %arg0, %c0_i32, %c0_i32_0 : i32, i32, i32
  }
  func.func @transform_1(%arg0: i32) -> (i32, i32) {
    %c0_i32 = arith.constant 0 : i32
    %c0_i32_0 = arith.constant 0 : i32
    %c0_i32_1 = arith.constant 0 : i32
    return %c0_i32, %c0_i32_0 : i32, i32
  }
  func.func @transform_2(%arg0: i32) -> (i32, i32) {
    %c0_i32 = arith.constant 0 : i32
    %c0_i32_0 = arith.constant 0 : i32
    %c0_i32_1 = arith.constant 0 : i32
    return %c0_i32, %c0_i32_0 : i32, i32
  }
  func.func @transform_3(%arg0: i32) -> (i32, i32) {
    %c0_i32 = arith.constant 0 : i32
    %c0_i32_0 = arith.constant 0 : i32
    %c0_i32_1 = arith.constant 0 : i32
    return %c0_i32, %c0_i32_0 : i32, i32
  }
  func.func @transform_4(%arg0: i32) -> (i32, i32) {
    %c0_i32 = arith.constant 0 : i32
    %c0_i32_0 = arith.constant 0 : i32
    %c0_i32_1 = arith.constant 0 : i32
    return %c0_i32, %c0_i32_0 : i32, i32
  }
  func.func @transform_5(%arg0: i32) -> (i32, i32) {
    %c0_i32 = arith.constant 0 : i32
    %c0_i32_0 = arith.constant 0 : i32
    %c0_i32_1 = arith.constant 0 : i32
    return %c0_i32, %c0_i32_0 : i32, i32
  }
  func.func @transform_6(%arg0: i32) -> (i32, i32, i32) {
    %c0_i32 = arith.constant 0 : i32
    %c0_i32_0 = arith.constant 0 : i32
    %c0_i32_1 = arith.constant 0 : i32
    return %arg0, %c0_i32, %c0_i32_0 : i32, i32, i32
  }
  func.func @transform_7(%arg0: i32) -> (i32, i32, i32) {
    %c0_i32 = arith.constant 0 : i32
    %c0_i32_0 = arith.constant 0 : i32
    %c0_i32_1 = arith.constant 0 : i32
    return %arg0, %c0_i32, %c0_i32_0 : i32, i32, i32
  }
  func.func @transform_8(%arg0: i32) -> (i32, i32, i32) {
    %c0_i32 = arith.constant 0 : i32
    %c0_i32_0 = arith.constant 0 : i32
    %c0_i32_1 = arith.constant 0 : i32
    return %arg0, %c0_i32, %c0_i32_0 : i32, i32, i32
  }
  func.func @transform_9(%arg0: i32) -> (i32, i32, i32) {
    %c0_i32 = arith.constant 0 : i32
    %c0_i32_0 = arith.constant 0 : i32
    %c0_i32_1 = arith.constant 0 : i32
    return %arg0, %c0_i32, %c0_i32_0 : i32, i32, i32
  }
}

module attributes {stable_mosaic.version = 11 : i64} {
  func.func @kernel(%arg0: i32, %arg1: memref<1x8x128xbf16, #tpu.memory_space<vmem>>, %arg2: memref<1x8x128xbf16, #tpu.memory_space<vmem>>, %arg3: memref<1x8x1xf32, #tpu.memory_space<vmem>>, %arg4: memref<1x8x1xf32, #tpu.memory_space<vmem>>, %arg5: memref<1x8x128xbf16, #tpu.memory_space<vmem>>, %arg6: memref<1x8x1xf32, #tpu.memory_space<vmem>>) attributes {dimension_semantics = [#tpu.dimension_semantics<parallel>], iteration_bounds = array<i64: 2>, scalar_prefetch = 0 : i64, scratch_operands = 0 : i64, tpu.core_type = #tpu.core_type<tc>, window_params = [{transform_indices = @transform_0, window_bounds = array<i64: 1, 8, 128>}, {transform_indices = @transform_1, window_bounds = array<i64: 1, 8, 128>}, {pipeline_mode = #tpu.pipeline_mode<synchronous>, transform_indices = @transform_2, window_bounds = array<i64: 1, 8, 1>}, {pipeline_mode = #tpu.pipeline_mode<synchronous>, transform_indices = @transform_3, window_bounds = array<i64: 1, 8, 1>}, {transform_indices = @transform_4, window_bounds = array<i64: 1, 8, 128>}, {transform_indices = @transform_5, window_bounds = array<i64: 1, 8, 1>}]} {
    %c0 = arith.constant 0 : index
    %c0_0 = arith.constant 0 : index
    %c0_1 = arith.constant 0 : index
    %0 = vector.load %arg2[%c0, %c0_0, %c0_1] : memref<1x8x128xbf16, #tpu.memory_space<vmem>>, vector<1x8x128xbf16>
    %1 = vector.shape_cast %0 : vector<1x8x128xbf16> to vector<8x128xbf16>
    %2 = arith.extf %1 : vector<8x128xbf16> to vector<8x128xf32>
    %c0_2 = arith.constant 0 : index
    %c0_3 = arith.constant 0 : index
    %c0_4 = arith.constant 0 : index
    %3 = vector.load %arg3[%c0_2, %c0_3, %c0_4] : memref<1x8x1xf32, #tpu.memory_space<vmem>>, vector<1x8x1xf32>
    %4 = vector.shape_cast %3 : vector<1x8x1xf32> to vector<8x1xf32>
    %5 = vector.broadcast %4 : vector<8x1xf32> to vector<8x128xf32>
    %6 = arith.mulf %2, %5 : vector<8x128xf32>
    %c0_5 = arith.constant 0 : index
    %c0_6 = arith.constant 0 : index
    %c0_7 = arith.constant 0 : index
    %7 = vector.load %arg4[%c0_5, %c0_6, %c0_7] : memref<1x8x1xf32, #tpu.memory_space<vmem>>, vector<1x8x1xf32>
    %8 = vector.shape_cast %7 : vector<1x8x1xf32> to vector<8x1xf32>
    %9 = vector.broadcast %8 : vector<8x1xf32> to vector<8x128xf32>
    %10 = arith.addf %6, %9 : vector<8x128xf32>
    %cst = arith.constant 0.000000e+00 : f32
    %11 = vector.broadcast %cst : f32 to vector<8x128xf32>
    %12 = arith.maximumf %10, %11 : vector<8x128xf32>
    %c0_8 = arith.constant 0 : index
    %c0_9 = arith.constant 0 : index
    %c0_10 = arith.constant 0 : index
    %13 = vector.load %arg1[%c0_8, %c0_9, %c0_10] : memref<1x8x128xbf16, #tpu.memory_space<vmem>>, vector<1x8x128xbf16>
    %14 = vector.shape_cast %13 : vector<1x8x128xbf16> to vector<8x128xbf16>
    %15 = arith.extf %14 : vector<8x128xbf16> to vector<8x128xf32>
    %16 = arith.addf %15, %12 : vector<8x128xf32>
    %17 = tpu.iota {dimensions = array<i32: 1>} : vector<1x128xi32>
    %c16_i32 = arith.constant 16 : i32
    %18 = vector.broadcast %c16_i32 : i32 to vector<1x128xi32>
    %19 = arith.cmpi slt, %17, %18 : vector<1x128xi32>
    %cst_11 = arith.constant 0.000000e+00 : f32
    %20 = vector.shape_cast %19 : vector<1x128xi1> to vector<1x128xi1>
    %21 = vector.broadcast %20 : vector<1x128xi1> to vector<8x128xi1>
    %22 = vector.broadcast %cst_11 : f32 to vector<8x128xf32>
    %23 = arith.select %21, %16, %22 : vector<8x128xi1>, vector<8x128xf32>
    %24 = arith.truncf %23 : vector<8x128xf32> to vector<8x128xbf16>
    %c0_12 = arith.constant 0 : index
    %c0_13 = arith.constant 0 : index
    %c0_14 = arith.constant 0 : index
    %25 = vector.load %arg5[%c0_12, %c0_13, %c0_14] : memref<1x8x128xbf16, #tpu.memory_space<vmem>>, vector<1x8x128xbf16>
    %26 = vector.shape_cast %25 : vector<1x8x128xbf16> to vector<8x128xbf16>
    %27 = vector.shape_cast %24 : vector<8x128xbf16> to vector<1x8x128xbf16>
    tpu.vector_store %arg5[%c0_12, %c0_13, %c0_14], %27 {strides = array<i32>} : memref<1x8x128xbf16, #tpu.memory_space<vmem>>, vector<1x8x128xbf16>,
    %cst_15 = arith.constant dense<0.000000e+00> : vector<8xf32>
    %28 = vector.multi_reduction <add>, %23, %cst_15 [1] : vector<8x128xf32> to vector<8xf32>
    %29 = vector.shape_cast %28 : vector<8xf32> to vector<8x1xf32>
    %c0_16 = arith.constant 0 : index
    %c0_17 = arith.constant 0 : index
    %c0_18 = arith.constant 0 : index
    %30 = vector.load %arg6[%c0_16, %c0_17, %c0_18] : memref<1x8x1xf32, #tpu.memory_space<vmem>>, vector<1x8x1xf32>
    %31 = vector.shape_cast %30 : vector<1x8x1xf32> to vector<8x1xf32>
    %32 = vector.shape_cast %29 : vector<8x1xf32> to vector<1x8x1xf32>
    tpu.vector_store %arg6[%c0_16, %c0_17, %c0_18], %32 {strides = array<i32>} : memref<1x8x1xf32, #tpu.memory_space<vmem>>, vector<1x8x1xf32>,
    return
  }
  func.func @transform_0(%arg0: i32) -> (i32, i32, i32) {
    %c0_i32 = arith.constant 0 : i32
    %c0_i32_0 = arith.constant 0 : i32
    %c0_i32_1 = arith.constant 0 : i32
    return %arg0, %c0_i32, %c0_i32_0 : i32, i32, i32
  }
  func.func @transform_1(%arg0: i32) -> (i32, i32, i32) {
    %c0_i32 = arith.constant 0 : i32
    %c0_i32_0 = arith.constant 0 : i32
    %c0_i32_1 = arith.constant 0 : i32
    return %arg0, %c0_i32, %c0_i32_0 : i32, i32, i32
  }
  func.func @transform_2(%arg0: i32) -> (i32, i32, i32) {
    %c0_i32 = arith.constant 0 : i32
    %c0_i32_0 = arith.constant 0 : i32
    %c0_i32_1 = arith.constant 0 : i32
    %c0_i32_2 = arith.constant 0 : i32
    return %c0_i32, %c0_i32_0, %c0_i32_1 : i32, i32, i32
  }
  func.func @transform_3(%arg0: i32) -> (i32, i32, i32) {
    %c0_i32 = arith.constant 0 : i32
    %c0_i32_0 = arith.constant 0 : i32
    %c0_i32_1 = arith.constant 0 : i32
    %c0_i32_2 = arith.constant 0 : i32
    return %c0_i32, %c0_i32_0, %c0_i32_1 : i32, i32, i32
  }
  func.func @transform_4(%arg0: i32) -> (i32, i32, i32) {
    %c0_i32 = arith.constant 0 : i32
    %c0_i32_0 = arith.constant 0 : i32
    %c0_i32_1 = arith.constant 0 : i32
    return %arg0, %c0_i32, %c0_i32_0 : i32, i32, i32
  }
  func.func @transform_5(%arg0: i32) -> (i32, i32, i32) {
    %c0_i32 = arith.constant 0 : i32
    %c0_i32_0 = arith.constant 0 : i32
    %c0_i32_1 = arith.constant 0 : i32
    return %arg0, %c0_i32, %c0_i32_0 : i32, i32, i32
  }
}

</mosaic_0001>

<bundles_post_ra>
// kernel: forward.4
= control target key start
LH: loop header
LB: loop body
LE: loop exit
PB: predicated region body
PF: predicated region fallthrough
CT: control target
= control target key end

     0   :  { %10 = vsyncpa [#allocation5], 0  ;;  %s707_s18 = smov 0   ;;  %s761_s0 = inlined_call_operand.vmem [shape: bf16[2,4,128], index: 0, kind: input, shape index: {}]   ;;  %s762_s1 = inlined_call_operand.hbm [shape: bf16[4,4], index: 1, kind: input, shape index: {}]   ;;  %s763_s2 = inlined_call_operand.vmem [shape: bf16[8,36], index: 2, kind: input, shape index: {}]   ;;  %s764_s3 = inlined_call_operand.vmem [shape: bf16[8,32], index: 3, kind: input, shape index: {}]   ;;  %s765_s4 = inlined_call_operand.vmem [shape: bf16[8,16], index: 4, kind: input, shape index: {}]   ;;  %s766_s5 = inlined_call_operand.vmem [shape: bf16[2,8,128], index: 5, kind: output, shape index: {}]  }
   0x1 LB: > { %s557_s19 = sadd.s32 4294967295, %s665_s18   ;;  %p559_p0 = scmp.ge.s32.totalorder %s665_s18, 1  ;;  %s665_s18 = sphi %s707_s18, %s16_s18  }
   0x2   : > { %p157_p1 = scmp.lt.s32.totalorder %s665_s18, 3  ;;  %s169_s22 = sshll.u32 %s762_s1, 4  ;;  %s170_s22 = int_to_ptr.hbm [resolvable:$true] %s169_s22 }
   0x3   : > { %p605_p3 = scmp.eq.s32.totalorder %s557_s19, 0  ;;  %s667_s23 = smov [#allocation4]  }
   0x4   : > { %p158_p2 = pnand %p559_p0, %p157_p1  ;;  %s171_s24 = sshll.u32 %s667_s23, 4  ;;  %s172_s24 = int_to_ptr.vmem [resolvable:$true] %s171_s24 }
   0x6   : > { %p601_p4 = pneg %p158_p2  ;;  %200 = sbr.rel (%p158_p2) target bundleno = 963 (0x3c3), region = 40 }
   0x8   : > { %p602_p5 = pnand %p605_p3, %p601_p4 }
   0xa   : > { %604 = dma.hbm_to_vmem [thread:$0]  (!%p602_p5), %s170_s22, 32, %s172_s24, [#allocation5]  }
   0xb   : > { %660 = dma.done.wait (%p605_p3), [#allocation5], 32  }
   0xc   : > { %662 = vsyncadd (%p605_p3), [#allocation5], 4294967264  ;;  %p227_p6 = scmp.lt.s32.totalorder %s557_s19, 1  ;;  %vm247_vm0 = vcmask 1041408   ;;  %v242_v2 = vld [vmem:[#allocation4] sm:$0x3]  ;;  %v236_v51 = vlaneseq }
   0xd   : > { %vm243_vm1 = vcmask 31744   ;;  %v668_v3 = vmov 0   ;;  %s669_s29 = smov 124   ;;  %s670_s30 = smov 126   ;;  %vm281_vm2 = vcmask 23552   ;;  %vm340_vm3 = vcmask 1014784  }
   0xe   : > { %s768_s19 = smov (!%p227_p6, %s557_s19), 1  ;;  %240 = vst [vmem:[#allocation2 + $0x8] sm:$0xf] %v668_v3  ;;  %s671_s6 = smov 4   ;;  %vm321_vm4 = vcmask 1031168   ;;  %vm331_vm5 = vcmask 1022976  }
   0xf   : > { %s564_s25 = sshll.u32 %s768_s19, 1  ;;  %239 = vst [vmem:[#allocation2] sm:$0xf] %v668_v3  ;;  %s672_s7 = smov 125   ;;  %vm312_vm6 = vcmask 1039360   ;;  %vm300_vm7 = vcmask 7168  }
  0x10   : > { %s230_s28 = scalar_lea.vmem %s761_s0, %s564_s25  ;;  %s673_s8 = smov 127   ;;  %vm290_vm8 = vcmask 15360   ;;  %v344_v50 = vld [vmem:[%s763_s2] sm:$0xf]  ;;  %vm365_vm9 = vcmask 293888   ;;  %v237_v52 = vand.u32 127, %v236_v51 }
  0x11   : > { %v241_v0 = vld [vmem:[%s230_s28] sm:$0x3]  ;;  %s674_s9 = smov 3   ;;  %s675_s10 = smov 1   ;;  %vm433_vm11 = vcmask 261120   ;;  %vm472_vm12 = vcmask 130048  }
  0x12   : > { %v249_v1 = vsel %vm247_vm0, %v241_v0, 0  ;;  %s676_s11 = smov 2   ;;  %vm238_vm10 = vcmp.lt.s32.totalorder %v237_v52, 16  ;;  %s565_s20 = sshll.u32 %s768_s19, 2 }
  0x13   : > { %258 = vmatpush.bf16.msra.mxu0 %v249_v1  ;;  %s234_s23 = scalar_lea.vmem %s766_s5, %s565_s20 }
  0x16   : > { %566 = vmatmul.msk.bf16.vlgmr.msra.gmra.mxu0 %vm243_vm1, %v242_v2 }
  0x93   : > { %v260_v4 = vpop.f32.mrf.mxu0 }
  0x94   : > { %v264_v5 = vpack.c.bf16 %v260_v4, %v260_v4 }
  0x96   : > { %265 = vst [vmem:[#allocation2 + $0x4] sm:$0x3] %v264_v5 }
  0x9b   : > { %v262_v6 = vpop.f32.mrf.mxu0 }
  0x9d   : > { %v304_v7 = vld [vmem:[#allocation2 + $0x4] sm:$0x3] }
  0x9e   : > { %v335_v8 = vld [vmem:[#allocation2 + $0x4] sm:$0x33]  ;;  %305 = vst [vmem:[#allocation3 + $0x8] sm:$0x3] %v304_v7  ;;  %v416_v7 = vld [vmem:[%s764_s3] sm:$0xf] }
  0x9f   : > { %v316_v9 = vld [vmem:[#allocation2 + $0x4] sm:$0x33]  ;;  %337 = vrot.lane.b32.xlu0 %v335_v8, %s669_s29 }
  0xa0   : > { %318 = vrot.lane.b32.xlu1 %v316_v9, %s670_s30  ;;  %v266_v10 = vld [vmem:[#allocation2] sm:$0x33] }
  0xa1   : > { %268 = vrot.lane.b32.xlu2 %v266_v10, %s671_s6  ;;  %v325_v11 = vld [vmem:[#allocation2 + $0x4] sm:$0x33] }
  0xa2   : > { %v306_v12 = vld [vmem:[#allocation2 + $0x4] sm:$0x33]  ;;  %v327_v14 = vrot.slane %v325_v11, 6 }
  0xa3   : > { %v275_v13 = vld [vmem:[#allocation2] sm:$0x33]  ;;  %v308_v15 = vrot.slane %v306_v12, 6 }
  0xa4   : > { %v277_v16 = vrot.slane %v275_v13, 6  ;;  %v294_v17 = vld [vmem:[#allocation2] sm:$0x33] }
  0xa5   : > { %v296_v18 = vrot.slane %v294_v17, 6  ;;  %v285_v19 = vld [vmem:[#allocation2] sm:$0x33] }
  0xa7   : > { %309 = vrot.lane.b32.xlu0 %v308_v15, %s673_s8 }
  0xa8   : > { %328 = vrot.lane.b32.xlu1 %v327_v14, %s672_s7 }
  0xa9   : > { %278 = vrot.lane.b32.xlu2 %v277_v16, %s674_s9 }
  0xaf   : > { %287 = vrot.lane.b32.xlu0 %v285_v19, %s676_s11 }
  0xb0   : > { %297 = vrot.lane.b32.xlu1 %v296_v18, %s675_s10  ;;  %v463_v18 = vld [vmem:[%s765_s4] sm:$0xf] }
  0xfb   : > { %v269_v20 = vpop.permute.xlu2 %268 }
  0xfc   : > { %v270_v21 = vrot.slane %v269_v20, 4 }
  0xfe   : > { %v272_v22 = vsel %vm243_vm1, %v269_v20, %v270_v21 }
  0xff   : > { %274 = vst [vmem:[#allocation3] sm:$0x3] %v272_v22 }
 0x103   : > { %v279_v23 = vpop.permute.xlu2 %278 }
 0x104   : > { %v280_v24 = vrot.slane %v279_v23, 4 }
 0x106   : > { %v282_v25 = vsel %vm281_vm2, %v279_v23, %v280_v24 }
 0x107   : > { %284 = vst [vmem:[#allocation3] sm:$0xc] %v282_v25 }
 0x111   : > { %v338_v26 = vpop.permute.xlu0 %337 }
 0x112   : > { %v319_v27 = vpop.permute.xlu1 %318  ;;  %v339_v28 = vrot.slane %v338_v26, 4 }
 0x113   : > { %v320_v29 = vrot.slane %v319_v27, 4 }
 0x114   : > { %v341_v30 = vsel %vm340_vm3, %v338_v26, %v339_v28 }
 0x115   : > { %v322_v31 = vsel %vm321_vm4, %v319_v27, %v320_v29  ;;  %343 = vst [vmem:[#allocation3 + $0x10] sm:$0x3] %v341_v30 }
 0x116   : > { %324 = vst [vmem:[#allocation3 + $0xc] sm:$0x3] %v322_v31 }
 0x119   : > { %v310_v33 = vpop.permute.xlu0 %309 }
 0x11a   : > { %v329_v32 = vpop.permute.xlu1 %328  ;;  %v311_v35 = vrot.slane %v310_v33, 4 }
 0x11b   : > { %v330_v34 = vrot.slane %v329_v32, 4 }
 0x11c   : > { %v313_v37 = vsel %vm312_vm6, %v310_v33, %v311_v35  ;;  %v349_v38 = vld [vmem:[#allocation3 + $0x10] sm:$0x3] }
 0x11d   : > { %v332_v36 = vsel %vm331_vm5, %v329_v32, %v330_v34  ;;  %v359_v39 = vunpack.c.l.b16 %v349_v38  ;;  %315 = vst [vmem:[#allocation3 + $0x8] sm:$0xc] %v313_v37 }
 0x11e   : > { %334 = vst [vmem:[#allocation3 + $0xc] sm:$0xc] %v332_v36 }
 0x11f   : > { %v362_v40 = vpack.c.b16 %v359_v39, %v359_v39 }
 0x121   : > { %v288_v42 = vpop.permute.xlu0 %287  ;;  %v370_v43 = vsel %vm247_vm0, %v362_v40, 0 }
 0x122   : > { %v298_v41 = vpop.permute.xlu1 %297  ;;  %v289_v45 = vrot.slane %v288_v42, 4  ;;  %377 = vmatpush.bf16.msra.mxu1 %v370_v43 }
 0x123   : > { %v299_v44 = vrot.slane %v298_v41, 4 }
 0x124   : > { %v291_v47 = vsel %vm290_vm8, %v288_v42, %v289_v45 }
 0x125   : > { %v301_v46 = vsel %vm300_vm7, %v298_v41, %v299_v44  ;;  %v593_v48 = vld [vmem:[#allocation3 + $0x8] sm:$0xff]  ;;  %293 = vst [vmem:[#allocation3 + $0x4] sm:$0x3] %v291_v47 }
 0x126   : > { %303 = vst [vmem:[#allocation3 + $0x4] sm:$0xc] %v301_v46  ;;  %378 = vmatpush.bf16.msra.mxu1 %v593_v48 }
 0x12d   : > { %v592_v49 = vld [vmem:[#allocation3] sm:$0xff] }
 0x12e   : > { %379 = vmatpush.bf16.msra.mxu1 %v592_v49 }
 0x131   : > { %575 = vmatmul.msk.bf16.vlgmr.msra.gmra.mxu1 %vm365_vm9, %v344_v50 }
 0x1ae   : > { %v381_v53 = vpop.f32.mrf.mxu1 }
 0x1af   : > { %v387_v54 = vsel %vm238_vm10, %v381_v53, 0.0 }
 0x1b0   : > { %v388_v55 = vpack.c.bf16 %v387_v54, %v387_v54 }
 0x1b2   : > { %389 = vst [vmem:[#allocation2 + $0x4] sm:$0xf] %v388_v55 }
 0x1b6   : > { %v383_v56 = vpop.f32.mrf.mxu1 }
 0x1b9   : > { %v408_v57 = vld [vmem:[#allocation2 + $0x4] sm:$0xff] }
 0x1ba   : > { %v390_v58 = vld [vmem:[#allocation2] sm:$0xff]  ;;  %410 = vrot.lane.b32.xlu0 %v408_v57, %s670_s30  ;;  %402 = vrot.lane.b32.xlu2 %v408_v57, %s673_s8 }
 0x1bb   : > { %v398_v59 = vld [vmem:[#allocation2 + $0x4] sm:$0xf]  ;;  %392 = vrot.lane.b32.xlu1 %v390_v58, %s675_s10 }
 0x1bc   : > { %399 = vst [vmem:[#allocation3 + $0x4] sm:$0xf] %v398_v59 }
 0x214   : > { %v403_v60 = vpop.permute.xlu2 %402 }
 0x215   : > { %v404_v61 = vrot.slane %v403_v60, 4 }
 0x217   : > { %v405_v62 = vsel %vm312_vm6, %v403_v60, %v404_v61 }
 0x218   : > { %407 = vst [vmem:[#allocation3 + $0x8] sm:$0xf] %v405_v62 }
 0x22c   : > { %v411_v63 = vpop.permute.xlu0 %410 }
 0x22d   : > { %v412_v0 = vrot.slane %v411_v63, 4  ;;  %v393_v1 = vpop.permute.xlu1 %392 }
 0x22e   : > { %v394_v2 = vrot.slane %v393_v1, 4 }
 0x22f   : > { %v413_v3 = vsel %vm321_vm4, %v411_v63, %v412_v0 }
 0x230   : > { %415 = vst [vmem:[#allocation3 + $0xc] sm:$0xf] %v413_v3  ;;  %v395_v4 = vsel %vm300_vm7, %v393_v1, %v394_v2 }
 0x231   : > { %397 = vst [vmem:[#allocation3] sm:$0xf] %v395_v4 }
 0x237   : > { %v595_v5 = vld [vmem:[#allocation3 + $0x8] sm:$0xff] }
 0x238   : > { %443 = vmatpush.bf16.msra.mxu2 %v595_v5  ;;  %v594_v6 = vld [vmem:[#allocation3] sm:$0xff] }
 0x23c   : > { %444 = vmatpush.bf16.msra.mxu2 %v594_v6 }
 0x23f   : > { %584 = vmatmul.msk.bf16.vlgmr.msra.gmra.mxu2 %vm433_vm11, %v416_v7 }
 0x2c2   : > { %v446_v8 = vpop.f32.mrf.mxu2 }
 0x2c3   : > { %v450_v9 = vsel %vm238_vm10, %v446_v8, 0.0 }
 0x2c4   : > { %v451_v10 = vpack.c.bf16 %v450_v9, %v450_v9 }
 0x2c6   : > { %452 = vst [vmem:[#allocation2 + $0x4] sm:$0xf] %v451_v10 }
 0x2ca   : > { %v448_v11 = vpop.f32.mrf.mxu2 }
 0x2cd   : > { %v455_v12 = vld [vmem:[#allocation2 + $0x4] sm:$0xff] }
 0x2ce   : > { %v453_v13 = vld [vmem:[#allocation2 + $0x4] sm:$0xf]  ;;  %457 = vrot.lane.b32.xlu2 %v455_v12, %s673_s8 }
 0x2cf   : > { %454 = vst [vmem:[#allocation3] sm:$0xf] %v453_v13 }
 0x328   : > { %v458_v14 = vpop.permute.xlu2 %457 }
 0x329   : > { %v459_v15 = vrot.slane %v458_v14, 4 }
 0x32b   : > { %v460_v16 = vsel %vm312_vm6, %v458_v14, %v459_v15 }
 0x32c   : > { %462 = vst [vmem:[#allocation3 + $0x4] sm:$0xf] %v460_v16 }
 0x333   : > { %v596_v17 = vld [vmem:[#allocation3] sm:$0xff] }
 0x334   : > { %483 = vmatpush.bf16.msra.mxu3 %v596_v17 }
 0x337   : > { %589 = vmatmul.msk.bf16.vlgmr.msra.gmra.mxu3 %vm472_vm12, %v463_v18 }
 0x3ba   : > { %v485_v19 = vpop.f32.mrf.mxu3 }
 0x3bb   : > { %v489_v20 = vsel %vm238_vm10, %v485_v19, 0.0 }
 0x3bc   : > { %v490_v21 = vpack.c.bf16 %v489_v20, %v489_v20 }
 0x3be   : > { %491 = vst [vmem:[%s234_s23] sm:$0xf] %v490_v21 }
 0x3c2   : > { %v487_v22 = vpop.f32.mrf.mxu3 }
 0x3c3 PF: > { %s16_s18 = sadd.s32 1, %s665_s18  }
 0x3c4   : > { %p13_p7 = scmp.ge.s32.totalorder %s16_s18, 4  }
 0x3c6   :  { %15 = sbr.rel (!%p13_p7) target bundleno = 1 (0x1), region = 75 }
 0x3cb   :  { %511 = vsyncpa [#allocation5], 1 }
 0x3cc   :  { %513 = vsyncpa [#allocation5 + $0x1], 1 }

// kernel: forward.5
= control target key start
LH: loop header
LB: loop body
LE: loop exit
PB: predicated region body
PF: predicated region fallthrough
CT: control target
= control target key end

     0   :  { %10 = vsyncpa [#allocation5], 0  ;;  %s708_s18 = smov 0   ;;  %s761_s0 = inlined_call_operand.vmem [shape: bf16[2,8,128], index: 0, kind: input, shape index: {}]   ;;  %s762_s1 = inlined_call_operand.hbm [shape: bf16[4,8], index: 1, kind: input, shape index: {}]   ;;  %s763_s2 = inlined_call_operand.vmem [shape: bf16[8,36], index: 2, kind: input, shape index: {}]   ;;  %s764_s3 = inlined_call_operand.vmem [shape: bf16[8,32], index: 3, kind: input, shape index: {}]   ;;  %s765_s4 = inlined_call_operand.vmem [shape: bf16[8,16], index: 4, kind: input, shape index: {}]   ;;  %s766_s5 = inlined_call_operand.vmem [shape: bf16[2,8,128], index: 5, kind: output, shape index: {}]  }
   0x1 LB: > { %s558_s19 = sadd.s32 4294967295, %s666_s18   ;;  %p560_p0 = scmp.ge.s32.totalorder %s666_s18, 1  ;;  %s666_s18 = sphi %s708_s18, %s16_s18  }
   0x2   : > { %p157_p1 = scmp.lt.s32.totalorder %s666_s18, 3  ;;  %s169_s22 = sshll.u32 %s762_s1, 4  ;;  %s170_s22 = int_to_ptr.hbm [resolvable:$true] %s169_s22 }
   0x3   : > { %p606_p3 = scmp.eq.s32.totalorder %s558_s19, 0  ;;  %s668_s23 = smov [#allocation4]  }
   0x4   : > { %p158_p2 = pnand %p560_p0, %p157_p1  ;;  %s171_s24 = sshll.u32 %s668_s23, 4  ;;  %s172_s24 = int_to_ptr.vmem [resolvable:$true] %s171_s24 }
   0x6   : > { %p602_p4 = pneg %p158_p2  ;;  %200 = sbr.rel (%p158_p2) target bundleno = 963 (0x3c3), region = 40 }
   0x8   : > { %p603_p5 = pnand %p606_p3, %p602_p4 }
   0xa   : > { %605 = dma.hbm_to_vmem [thread:$0]  (!%p603_p5), %s170_s22, 32, %s172_s24, [#allocation5]  }
   0xb   : > { %661 = dma.done.wait (%p606_p3), [#allocation5], 32  }
   0xc   : > { %663 = vsyncadd (%p606_p3), [#allocation5], 4294967264  ;;  %p227_p6 = scmp.lt.s32.totalorder %s558_s19, 1  ;;  %vm247_vm0 = vcmask 1043456   ;;  %v242_v2 = vld [vmem:[#allocation4] sm:$0x3]  ;;  %v236_v51 = vlaneseq }
   0xd   : > { %vm243_vm1 = vcmask 64512   ;;  %v669_v3 = vmov 0   ;;  %s670_s29 = smov 124   ;;  %s671_s30 = smov 126   ;;  %vm271_vm2 = vcmask 31744   ;;  %vm281_vm3 = vcmask 23552  }
   0xe   : > { %s768_s19 = smov (!%p227_p6, %s558_s19), 1  ;;  %240 = vst [vmem:[#allocation2 + $0x8] sm:$0xf] %v669_v3  ;;  %s672_s6 = smov 4   ;;  %vm340_vm4 = vcmask 1014784   ;;  %vm321_vm5 = vcmask 1031168  }
   0xf   : > { %s565_s25 = sshll.u32 %s768_s19, 2  ;;  %239 = vst [vmem:[#allocation2] sm:$0xf] %v669_v3  ;;  %s673_s7 = smov 125   ;;  %vm331_vm6 = vcmask 1022976   ;;  %vm312_vm7 = vcmask 1039360  }
  0x10   : > { %s230_s28 = scalar_lea.vmem %s761_s0, %s565_s25  ;;  %s674_s8 = smov 127   ;;  %vm369_vm8 = vcmask 1041408   ;;  %vm300_vm9 = vcmask 7168   ;;  %vm290_vm10 = vcmask 15360   ;;  %v344_v50 = vld [vmem:[%s763_s2] sm:$0xf] }
  0x11   : > { %v241_v0 = vld [vmem:[%s230_s28] sm:$0xf]  ;;  %s675_s9 = smov 3   ;;  %s676_s10 = smov 1   ;;  %vm365_vm11 = vcmask 293888   ;;  %v237_v52 = vand.u32 127, %v236_v51 }
  0x12   : > { %v249_v1 = vsel %vm247_vm0, %v241_v0, 0  ;;  %s677_s11 = smov 2   ;;  %vm434_vm13 = vcmask 261120   ;;  %vm473_vm14 = vcmask 130048   ;;  %s234_s22 = scalar_lea.vmem %s766_s5, %s565_s25 }
  0x13   : > { %258 = vmatpush.bf16.msra.mxu0 %v249_v1  ;;  %vm238_vm12 = vcmp.lt.s32.totalorder %v237_v52, 16 }
  0x16   : > { %567 = vmatmul.msk.bf16.vlgmr.msra.gmra.mxu0 %vm243_vm1, %v242_v2 }
  0x93   : > { %v260_v4 = vpop.f32.mrf.mxu0 }
  0x94   : > { %v264_v5 = vpack.c.bf16 %v260_v4, %v260_v4 }
  0x96   : > { %265 = vst [vmem:[#allocation2 + $0x4] sm:$0x3] %v264_v5 }
  0x9b   : > { %v262_v6 = vpop.f32.mrf.mxu0 }
  0x9d   : > { %v304_v7 = vld [vmem:[#allocation2 + $0x4] sm:$0x3] }
  0x9e   : > { %v335_v8 = vld [vmem:[#allocation2 + $0x4] sm:$0x33]  ;;  %305 = vst [vmem:[#allocation3 + $0x8] sm:$0x3] %v304_v7  ;;  %v417_v7 = vld [vmem:[%s764_s3] sm:$0xf] }
  0x9f   : > { %v316_v9 = vld [vmem:[#allocation2 + $0x4] sm:$0x33]  ;;  %337 = vrot.lane.b32.xlu0 %v335_v8, %s670_s29 }
  0xa0   : > { %318 = vrot.lane.b32.xlu1 %v316_v9, %s671_s30  ;;  %v266_v10 = vld [vmem:[#allocation2] sm:$0x33] }
  0xa1   : > { %268 = vrot.lane.b32.xlu2 %v266_v10, %s672_s6  ;;  %v325_v11 = vld [vmem:[#allocation2 + $0x4] sm:$0x33] }
  0xa2   : > { %v306_v12 = vld [vmem:[#allocation2 + $0x4] sm:$0x33]  ;;  %v327_v14 = vrot.slane %v325_v11, 6 }
  0xa3   : > { %v275_v13 = vld [vmem:[#allocation2] sm:$0x33]  ;;  %v308_v15 = vrot.slane %v306_v12, 6 }
  0xa4   : > { %v277_v16 = vrot.slane %v275_v13, 6  ;;  %v294_v17 = vld [vmem:[#allocation2] sm:$0x33] }
  0xa5   : > { %v296_v18 = vrot.slane %v294_v17, 6  ;;  %v285_v19 = vld [vmem:[#allocation2] sm:$0x33] }
  0xa7   : > { %309 = vrot.lane.b32.xlu0 %v308_v15, %s674_s8 }
  0xa8   : > { %328 = vrot.lane.b32.xlu1 %v327_v14, %s673_s7 }
  0xa9   : > { %278 = vrot.lane.b32.xlu2 %v277_v16, %s675_s9 }
  0xaf   : > { %287 = vrot.lane.b32.xlu0 %v285_v19, %s677_s11 }
  0xb0   : > { %297 = vrot.lane.b32.xlu1 %v296_v18, %s676_s10  ;;  %v464_v18 = vld [vmem:[%s765_s4] sm:$0xf] }
  0xfb   : > { %v269_v20 = vpop.permute.xlu2 %268 }
  0xfc   : > { %v270_v21 = vrot.slane %v269_v20, 4 }
  0xfe   : > { %v272_v22 = vsel %vm271_vm2, %v269_v20, %v270_v21 }
  0xff   : > { %274 = vst [vmem:[#allocation3] sm:$0x3] %v272_v22 }
 0x103   : > { %v279_v23 = vpop.permute.xlu2 %278 }
 0x104   : > { %v280_v24 = vrot.slane %v279_v23, 4 }
 0x106   : > { %v282_v25 = vsel %vm281_vm3, %v279_v23, %v280_v24 }
 0x107   : > { %284 = vst [vmem:[#allocation3] sm:$0xc] %v282_v25 }
 0x111   : > { %v338_v26 = vpop.permute.xlu0 %337 }
 0x112   : > { %v319_v27 = vpop.permute.xlu1 %318  ;;  %v339_v28 = vrot.slane %v338_v26, 4 }
 0x113   : > { %v320_v29 = vrot.slane %v319_v27, 4 }
 0x114   : > { %v341_v30 = vsel %vm340_vm4, %v338_v26, %v339_v28 }
 0x115   : > { %v322_v31 = vsel %vm321_vm5, %v319_v27, %v320_v29  ;;  %343 = vst [vmem:[#allocation3 + $0x10] sm:$0x3] %v341_v30 }
 0x116   : > { %324 = vst [vmem:[#allocation3 + $0xc] sm:$0x3] %v322_v31 }
 0x119   : > { %v310_v33 = vpop.permute.xlu0 %309 }
 0x11a   : > { %v329_v32 = vpop.permute.xlu1 %328  ;;  %v311_v35 = vrot.slane %v310_v33, 4 }
 0x11b   : > { %v330_v34 = vrot.slane %v329_v32, 4 }
 0x11c   : > { %v313_v37 = vsel %vm312_vm7, %v310_v33, %v311_v35  ;;  %v349_v38 = vld [vmem:[#allocation3 + $0x10] sm:$0x3] }
 0x11d   : > { %v332_v36 = vsel %vm331_vm6, %v329_v32, %v330_v34  ;;  %v359_v39 = vunpack.c.l.b16 %v349_v38  ;;  %315 = vst [vmem:[#allocation3 + $0x8] sm:$0xc] %v313_v37 }
 0x11e   : > { %334 = vst [vmem:[#allocation3 + $0xc] sm:$0xc] %v332_v36 }
 0x11f   : > { %v362_v40 = vpack.c.b16 %v359_v39, %v359_v39 }
 0x121   : > { %v288_v42 = vpop.permute.xlu0 %287  ;;  %v371_v43 = vsel %vm369_vm8, %v362_v40, 0 }
 0x122   : > { %v298_v41 = vpop.permute.xlu1 %297  ;;  %v289_v45 = vrot.slane %v288_v42, 4  ;;  %378 = vmatpush.bf16.msra.mxu1 %v371_v43 }
 0x123   : > { %v299_v44 = vrot.slane %v298_v41, 4 }
 0x124   : > { %v291_v47 = vsel %vm290_vm10, %v288_v42, %v289_v45 }
 0x125   : > { %v301_v46 = vsel %vm300_vm9, %v298_v41, %v299_v44  ;;  %v594_v48 = vld [vmem:[#allocation3 + $0x8] sm:$0xff]  ;;  %293 = vst [vmem:[#allocation3 + $0x4] sm:$0x3] %v291_v47 }
 0x126   : > { %303 = vst [vmem:[#allocation3 + $0x4] sm:$0xc] %v301_v46  ;;  %379 = vmatpush.bf16.msra.mxu1 %v594_v48 }
 0x12d   : > { %v593_v49 = vld [vmem:[#allocation3] sm:$0xff] }
 0x12e   : > { %380 = vmatpush.bf16.msra.mxu1 %v593_v49 }
 0x131   : > { %576 = vmatmul.msk.bf16.vlgmr.msra.gmra.mxu1 %vm365_vm11, %v344_v50 }
 0x1ae   : > { %v382_v53 = vpop.f32.mrf.mxu1 }
 0x1af   : > { %v388_v54 = vsel %vm238_vm12, %v382_v53, 0.0 }
 0x1b0   : > { %v389_v55 = vpack.c.bf16 %v388_v54, %v388_v54 }
 0x1b2   : > { %390 = vst [vmem:[#allocation2 + $0x4] sm:$0xf] %v389_v55 }
 0x1b6   : > { %v384_v56 = vpop.f32.mrf.mxu1 }
 0x1b9   : > { %v409_v57 = vld [vmem:[#allocation2 + $0x4] sm:$0xff] }
 0x1ba   : > { %v391_v58 = vld [vmem:[#allocation2] sm:$0xff]  ;;  %411 = vrot.lane.b32.xlu0 %v409_v57, %s671_s30  ;;  %403 = vrot.lane.b32.xlu2 %v409_v57, %s674_s8 }
 0x1bb   : > { %v399_v59 = vld [vmem:[#allocation2 + $0x4] sm:$0xf]  ;;  %393 = vrot.lane.b32.xlu1 %v391_v58, %s676_s10 }
 0x1bc   : > { %400 = vst [vmem:[#allocation3 + $0x4] sm:$0xf] %v399_v59 }
 0x214   : > { %v404_v60 = vpop.permute.xlu2 %403 }
 0x215   : > { %v405_v61 = vrot.slane %v404_v60, 4 }
 0x217   : > { %v406_v62 = vsel %vm312_vm7, %v404_v60, %v405_v61 }
 0x218   : > { %408 = vst [vmem:[#allocation3 + $0x8] sm:$0xf] %v406_v62 }
 0x22c   : > { %v412_v63 = vpop.permute.xlu0 %411 }
 0x22d   : > { %v413_v0 = vrot.slane %v412_v63, 4  ;;  %v394_v1 = vpop.permute.xlu1 %393 }
 0x22e   : > { %v395_v2 = vrot.slane %v394_v1, 4 }
 0x22f   : > { %v414_v3 = vsel %vm321_vm5, %v412_v63, %v413_v0 }
 0x230   : > { %416 = vst [vmem:[#allocation3 + $0xc] sm:$0xf] %v414_v3  ;;  %v396_v4 = vsel %vm300_vm9, %v394_v1, %v395_v2 }
 0x231   : > { %398 = vst [vmem:[#allocation3] sm:$0xf] %v396_v4 }
 0x237   : > { %v596_v5 = vld [vmem:[#allocation3 + $0x8] sm:$0xff] }
 0x238   : > { %444 = vmatpush.bf16.msra.mxu2 %v596_v5  ;;  %v595_v6 = vld [vmem:[#allocation3] sm:$0xff] }
 0x23c   : > { %445 = vmatpush.bf16.msra.mxu2 %v595_v6 }
 0x23f   : > { %585 = vmatmul.msk.bf16.vlgmr.msra.gmra.mxu2 %vm434_vm13, %v417_v7 }
 0x2c2   : > { %v447_v8 = vpop.f32.mrf.mxu2 }
 0x2c3   : > { %v451_v9 = vsel %vm238_vm12, %v447_v8, 0.0 }
 0x2c4   : > { %v452_v10 = vpack.c.bf16 %v451_v9, %v451_v9 }
 0x2c6   : > { %453 = vst [vmem:[#allocation2 + $0x4] sm:$0xf] %v452_v10 }
 0x2ca   : > { %v449_v11 = vpop.f32.mrf.mxu2 }
 0x2cd   : > { %v456_v12 = vld [vmem:[#allocation2 + $0x4] sm:$0xff] }
 0x2ce   : > { %v454_v13 = vld [vmem:[#allocation2 + $0x4] sm:$0xf]  ;;  %458 = vrot.lane.b32.xlu2 %v456_v12, %s674_s8 }
 0x2cf   : > { %455 = vst [vmem:[#allocation3] sm:$0xf] %v454_v13 }
 0x328   : > { %v459_v14 = vpop.permute.xlu2 %458 }
 0x329   : > { %v460_v15 = vrot.slane %v459_v14, 4 }
 0x32b   : > { %v461_v16 = vsel %vm312_vm7, %v459_v14, %v460_v15 }
 0x32c   : > { %463 = vst [vmem:[#allocation3 + $0x4] sm:$0xf] %v461_v16 }
 0x333   : > { %v597_v17 = vld [vmem:[#allocation3] sm:$0xff] }
 0x334   : > { %484 = vmatpush.bf16.msra.mxu3 %v597_v17 }
 0x337   : > { %590 = vmatmul.msk.bf16.vlgmr.msra.gmra.mxu3 %vm473_vm14, %v464_v18 }
 0x3ba   : > { %v486_v19 = vpop.f32.mrf.mxu3 }
 0x3bb   : > { %v490_v20 = vsel %vm238_vm12, %v486_v19, 0.0 }
 0x3bc   : > { %v491_v21 = vpack.c.bf16 %v490_v20, %v490_v20 }
 0x3be   : > { %492 = vst [vmem:[%s234_s22] sm:$0xf] %v491_v21 }
 0x3c2   : > { %v488_v22 = vpop.f32.mrf.mxu3 }
 0x3c3 PF: > { %s16_s18 = sadd.s32 1, %s666_s18  }
 0x3c4   : > { %p13_p7 = scmp.ge.s32.totalorder %s16_s18, 4  }
 0x3c6   :  { %15 = sbr.rel (!%p13_p7) target bundleno = 1 (0x1), region = 75 }
 0x3cb   :  { %512 = vsyncpa [#allocation5], 1 }
 0x3cc   :  { %514 = vsyncpa [#allocation5 + $0x1], 1 }

// kernel: forward.7
= control target key start
LH: loop header
LB: loop body
LE: loop exit
PB: predicated region body
PF: predicated region fallthrough
CT: control target
= control target key end

     0   :  { %11 = vsyncpa [#allocation3], 0  ;;  %s647_s0 = inlined_call_operand.vmem [shape: bf16[2,8,128], index: 0, kind: input, shape index: {}]   ;;  %s648_s1 = inlined_call_operand.vmem [shape: bf16[2,8,128], index: 1, kind: input, shape index: {}]   ;;  %s649_s2 = inlined_call_operand.vmem [shape: f32[1,8,1], index: 2, kind: input, shape index: {}]   ;;  %s650_s3 = inlined_call_operand.vmem [shape: f32[1,8,1], index: 3, kind: input, shape index: {}]   ;;  %s651_s4 = inlined_call_operand.hbm [shape: bf16[2,8,128], index: 4, kind: output, shape index: {0}]   ;;  %s652_s5 = inlined_call_operand.vmem [shape: f32[2,8,1], index: 5, kind: output, shape index: {1}]  }
   0x1   :  { %13 = vsyncpa [#allocation3 + $0x1], 0  ;;  %s546_s18 = smov 0   ;;  %s548_s19 = smov 0  }
   0x2   :  { %s550_s20 = smov 0   ;;  %s552_s21 = smov 0  }
   0x3 LB: > { %s567_s22 = sadd.s32 4294967295, %s513_s21   ;;  %s398_s23 = sadd.s32 4294967294, %s513_s21   ;;  %s513_s21 = sphi %s552_s21, %s658_s21   ;;  %s509_s20 = sphi %s550_s20, %s657_s20   ;;  %s505_s19 = sphi %s548_s19, %s656_s19   ;;  %s501_s18 = sphi %s546_s18, %s655_s18  }
   0x4   : > { %s571_s24 = sadd.s32 1, %s513_s21   ;;  %s120_s25 = sadd.s32 1, %s509_s20 }
   0x5   : > { %s117_s26 = ssub.s32 %s513_s21, %s571_s24  ;;  %p130_p0 = scmp.ne.s32.totalorder %s509_s20, %s505_s19 }
   0x6   : > { %p118_p1 = scmp.eq.s32.totalorder %s117_s26, 0  ;;  %p131_p2 = scmp.eq.s32.totalorder %s567_s22, 1 }
   0x7   : > { %p136_p3 = scmp.ne.s32.totalorder %s505_s19, %s501_s18  ;;  %p137_p4 = scmp.eq.s32.totalorder %s398_s23, 1 }
   0x8   : > { %s582_s27 = scalar_select %p118_p1, %s509_s20, %s120_s25  }
   0x9   : > { %p584_p5 = por %p131_p2, %p130_p0  ;;  %p588_p6 = por %p137_p4, %p136_p3 }
   0xa   : > { %p401_p7 = scmp.ge.s32.totalorder %s513_s21, 1  ;;  %p201_p8 = scmp.lt.s32.totalorder %s513_s21, 3 }
   0xc   : > { %p202_p9 = pnand %p401_p7, %p201_p8 }
   0xd   : > { %p236_p10 = scmp.lt.s32.totalorder (!%p202_p9), %s567_s22, 1  ;;  %s227_s17 = sand.u32 (!%p202_p9), 1, %s505_s19  }
   0xe   : > { %205 = sbr.rel (%p202_p9) target bundleno = 268 (0x10c), region = 36  ;;  %s407_s23 = sshll.u32 (!%p202_p9), %s567_s22, 2 }
   0xf   : > { %s402_s25 = sshll.u32 (!%p202_p9), %s227_s17, 2  ;;  %s295_s6 = scalar_lea.hbm (!%p202_p9), %s651_s4, %s407_s23 }
  0x10   : > { %s229_s7 = scalar_lea.vmem (!%p202_p9), [#allocation2], %s402_s25  ;;  %s471_s15 = scalar_lea.hbm (!%p202_p9), %s651_s4, 8 }
  0x11   : > { %s297_s8 = sshll.u32 (!%p202_p9), %s229_s7, 4  ;;  %s298_s8 = int_to_ptr.vmem [resolvable:$true] %s297_s8 }
  0x13   : > { %v250_v0 = vld [vmem:[%s649_s2] sm:$0xff]  ;;  %v515_v1 = vmov 0   ;;  %s602_s9 = scalar_select %p236_p10, %s567_s22, 1  ;;  %v268_v6 = vlaneseq }
  0x14   : > { %450 = vset.pattern.permute.xlu0 %v515_v1  ;;  %v257_v2 = vld [vmem:[%s650_s3] sm:$0xff]  ;;  %s281_s22 = scalar_lea.sflag [#allocation3], %s227_s17 }
  0x15   : > { %253 = vperm.xlu0 %450, %v250_v0   ;;  %s403_s10 = sshll.u32 %s602_s9, 2  ;;  %v269_v10 = vand.u32 127, %v268_v6 }
  0x16   : > { %s243_s13 = scalar_lea.vmem %s648_s1, %s403_s10  ;;  %s239_s16 = scalar_lea.vmem %s647_s0, %s403_s10 }
  0x17   : > { %v248_v4 = vld [vmem:[%s243_s13] sm:$0xf]  ;;  %vm270_vm0 = vcmp.lt.s32.totalorder %v269_v10, 16  ;;  %s299_s10 = sshll.u32 %s295_s6, 4  ;;  %s300_s10 = int_to_ptr.hbm [resolvable:$true] %s299_s10 }
  0x18   : > { %v249_v5 = vunpack.c.l.bf16 %v248_v4  ;;  %v265_v7 = vld [vmem:[%s239_s16] sm:$0xf]  ;;  %s465_s11 = sshra.s32 %s300_s10, 4  ;;  %s466_s11 = int_to_ptr.hbm [resolvable:$true] %s465_s11 }
  0x19   : > { %v266_v12 = vunpack.c.l.bf16 %v265_v7  ;;  %s467_s12 = scalar_lea.hbm %s466_s11, 4  ;;  %p472_p0 = scmp.lt.s32.totalorder %s466_s11, %s651_s4 }
  0x1a   : > { %p468_p11 = scmp.ne.s32.totalorder %s466_s11, %s467_s12  ;;  %p473_p1 = scmp.lt.s32.totalorder %s471_s15, %s467_s12 }
  0x1c   : > { %p469_p12 = pnand %p468_p11, %p584_p5  ;;  %p474_p2 = por %p473_p1, %p472_p0 }
  0x1d   : > { %260 = vperm.xlu0 %450, %v257_v2  }
  0x1e   : > { %p470_p13 = pneg %p469_p12 }
  0x20   : > { %p475_p3 = pnand %p474_p2, %p470_p13 }
  0x87   : > { %v254_v3 = vpop.permute.xlu0 %253 }
  0x88   : > { %v256_v8 = vmul.f32 %v254_v3, %v249_v5 }
  0x8f   : > { %v261_v9 = vpop.permute.xlu0 %260 }
  0x90   : > { %v263_v11 = vadd.f32 %v261_v9, %v256_v8 }
  0x92   : > { %v264_v13 = vmax.f32 %v263_v11, 0.0 }
  0x94   : > { %v267_v14 = vadd.f32 %v266_v12, %v264_v13 }
  0x96   : > { %v273_v15 = vsel %vm270_vm0, %v267_v14, 0.0 }
  0x97   : > { %276 = vadd.xlane.f32.xlu1 %v273_v15  ;;  %v274_v16 = vpack.c.bf16 %v273_v15, %v273_v15 }
  0x99   : > { %275 = vst [vmem:[%s229_s7] sm:$0xf] %v274_v16 }
  0x9a   : > { %478 = shalt.err (!%p475_p3)
}
  0x9b   : > { %410 = dma.vmem_to_hbm [thread:$0]  (%p584_p5), %s298_s8, 64, %s300_s10, %s281_s22   ;;  %vm278_vm1 = vcmask 7168  }
  0x9c   : > { %s405_s17 = sshll.u32 %s602_s9, 3 }
  0x9d   : > { %s247_s30 = scalar_lea.vmem %s652_s5, %s405_s17 }
 0x10a   : > { %v277_v17 = vpop.xlane.xlu1 %276 }
 0x10b   : > { %279 = vst.msk [vmem:[%s247_s30] sm:$0xff] %vm278_vm1, %v277_v17 }
 0x10c PF: > { %p416_p4 = scmp.ge.s32.totalorder %s513_s21, 2  ;;  %s314_s6 = sand.u32 1, %s501_s18  }
 0x10d   : > { %s315_s28 = scalar_lea.sflag [#allocation3], %s314_s6 }
 0x10e   : > { %p413_p7 = pnand %p416_p4, %p588_p6 }
 0x110   : > { %p414_p8 = pneg %p413_p7 }
 0x112   : > { %496 = dma.done.wait (%p414_p8), %s315_s28, 64  }
 0x113   : > { %498 = vsyncadd (%p414_p8), %s315_s28, 4294967232  ;;  %p16_p5 = scmp.ge.s32.totalorder %s571_s24, 4   ;;  %s655_s18 = smov %s505_s19 }
 0x114   : > { %s656_s19 = smov %s509_s20  ;;  %s657_s20 = smov %s582_s27 }
 0x115   : > { %s658_s21 = smov %s571_s24  ;;  %18 = sbr.rel (!%p16_p5) target bundleno = 3 (0x3), region = 86 }
 0x11a   :  { %328 = vsyncpa [#allocation3], 1 }
 0x11b   :  { %330 = vsyncpa [#allocation3 + $0x1], 1 }

// kernel: forward.6
= control target key start
LH: loop header
LB: loop body
LE: loop exit
PB: predicated region body
PF: predicated region fallthrough
CT: control target
= control target key end

     0   :  { %15 = vsyncpa [#allocation5], 0  ;;  %s1219_s0 = inlined_call_operand.vmem [shape: bf16[2,8,128], index: 0, kind: input, shape index: {}]   ;;  %s1220_s1 = inlined_call_operand.vmem [shape: bf16[4,8], index: 1, kind: input, shape index: {}]   ;;  %s1221_s2 = inlined_call_operand.vmem [shape: bf16[8,36], index: 2, kind: input, shape index: {}]   ;;  %s1222_s3 = inlined_call_operand.hbm [shape: bf16[8,32], index: 3, kind: input, shape index: {}]   ;;  %s1223_s4 = inlined_call_operand.hbm [shape: bf16[8,16], index: 4, kind: input, shape index: {}]   ;;  %s1224_s5 = inlined_call_operand.hbm [shape: bf16[8,8], index: 5, kind: input, shape index: {}]   ;;  %s1225_s6 = inlined_call_operand.vmem [shape: bf16[2,8,128], index: 6, kind: output, shape index: {0}]   ;;  %s1226_s7 = inlined_call_operand.vmem [shape: bf16[2,8,128], index: 7, kind: output, shape index: {1}]   ;;  %s1227_s8 = inlined_call_operand.vmem [shape: f32[2,8,1], index: 8, kind: output, shape index: {2}]   ;;  %s1228_s9 = inlined_call_operand.vmem [shape: f32[2,8,1], index: 9, kind: output, shape index: {3}]  }
   0x1   :  { %16 = vsyncpa [#allocation7], 0  ;;  %s1129_s30 = smov 0  }
   0x2 LB: > { %s292_s12 = sshll.u32 %s1223_s4, 4  ;;  %s865_s13 = sadd.s32 4294967295, %s1065_s30   ;;  %s1065_s30 = sphi %s1129_s30, %s22_s30   ;;  %s293_s12 = int_to_ptr.hbm [resolvable:$true] %s292_s12 }
   0x3   : > { %p867_p0 = scmp.ge.s32.totalorder %s1065_s30, 1  ;;  %p262_p1 = scmp.lt.s32.totalorder %s1065_s30, 3 }
   0x4   : > { %p935_p2 = scmp.eq.s32.totalorder %s865_s13, 0  ;;  %s1067_s15 = smov [#allocation6]  }
   0x5   : > { %p1140_p3 = pnand %p867_p0, %p262_p1  ;;  %s294_s16 = sshll.u32 %s1067_s15, 4  ;;  %s295_s16 = int_to_ptr.vmem [resolvable:$true] %s294_s16 }
   0x6   : > { %s280_s19 = sshll.u32 %s1222_s3, 4  ;;  %s304_s22 = sshll.u32 %s1224_s5, 4  ;;  %s281_s19 = int_to_ptr.hbm [resolvable:$true] %s280_s19  ;;  %s305_s22 = int_to_ptr.hbm [resolvable:$true] %s304_s22 }
   0x7   : > { %p925_p4 = pneg %p1140_p3  ;;  %s1068_s23 = smov [#allocation4]  }
   0x8   : > { %s282_s24 = sshll.u32 %s1068_s23, 4  ;;  %s1069_s25 = smov [#allocation8]   ;;  %s283_s24 = int_to_ptr.vmem [resolvable:$true] %s282_s24 }
   0x9   : > { %p926_p5 = pnand %p935_p2, %p925_p4  ;;  %s306_s26 = sshll.u32 %s1069_s25, 4  ;;  %s307_s26 = int_to_ptr.vmem [resolvable:$true] %s306_s26 }
   0xa   : > { %326 = sbr.rel (%p1140_p3) target bundleno = 969 (0x3c9), region = 44 }
   0xb   : > { %931 = dma.hbm_to_vmem [thread:$0]  (!%p926_p5), %s293_s12, 64, %s295_s16, [#allocation7]  }
   0xc   : > { %928 = dma.hbm_to_vmem [thread:$0]  (!%p926_p5), %s281_s19, 64, %s283_s24, [#allocation5]  }
   0xd   : > { %934 = dma.hbm_to_vmem [thread:$0]  (!%p926_p5), %s305_s22, 64, %s307_s26, [#allocation7]  }
   0xf   : > { %1056 = dma.done.wait (%p935_p2), [#allocation5], 64  }
  0x10   : > { %1058 = vsyncadd (%p935_p2), [#allocation5], 4294967232 }
  0x11   : > { %1060 = dma.done.wait (%p935_p2), [#allocation7], 128  }
  0x12   : > { %1062 = vsyncadd (%p935_p2), [#allocation7], 4294967168  ;;  %p383_p6 = scmp.lt.s32.totalorder %s865_s13, 1  ;;  %vm415_vm0 = vcmask 1043456   ;;  %v410_v2 = vld [vmem:[%s1220_s1] sm:$0x3]  ;;  %v404_v51 = vlaneseq }
  0x13   : > { %vm411_vm1 = vcmask 64512   ;;  %v1070_v3 = vmov 0   ;;  %s1071_s14 = smov 124   ;;  %s1072_s15 = smov 126   ;;  %vm439_vm2 = vcmask 31744   ;;  %vm449_vm3 = vcmask 23552  }
  0x14   : > { %s1231_s13 = smov (!%p383_p6, %s865_s13), 1  ;;  %408 = vst [vmem:[#allocation2 + $0x8] sm:$0xf] %v1070_v3  ;;  %s1073_s16 = smov 4   ;;  %vm508_vm4 = vcmask 1014784   ;;  %vm489_vm5 = vcmask 1031168  }
  0x15   : > { %s1162_s27 = sshll.u32 %s1231_s13, 2  ;;  %407 = vst [vmem:[#allocation2] sm:$0xf] %v1070_v3  ;;  %s1074_s17 = smov 125   ;;  %vm499_vm6 = vcmask 1022976   ;;  %vm480_vm7 = vcmask 1039360  }
  0x16   : > { %s386_s10 = scalar_lea.vmem %s1219_s0, %s1162_s27  ;;  %s1075_s18 = smov 127   ;;  %vm537_vm8 = vcmask 1041408   ;;  %vm468_vm9 = vcmask 7168   ;;  %vm458_vm10 = vcmask 15360   ;;  %v512_v50 = vld [vmem:[%s1221_s2] sm:$0xf] }
  0x17   : > { %v409_v0 = vld [vmem:[%s386_s10] sm:$0xf]  ;;  %s1076_s19 = smov 3   ;;  %s1077_s20 = smov 1   ;;  %vm533_vm11 = vcmask 293888   ;;  %v1181_v52 = vand.u32 127, %v404_v51 }
  0x18   : > { %v417_v1 = vsel %vm415_vm0, %v409_v0, 0  ;;  %s1078_s21 = smov 2   ;;  %vm602_vm13 = vcmask 261120   ;;  %s394_s26 = scalar_lea.vmem %s1226_s7, %s1162_s27  ;;  %vm641_vm14 = vcmask 130048  }
  0x19   : > { %426 = vmatpush.bf16.msra.mxu0 %v417_v1  ;;  %vm406_vm12 = vcmp.lt.s32.totalorder %v1181_v52, 16  ;;  %s879_s28 = sshll.u32 %s1231_s13, 3 }
  0x1a   : > { %s398_s11 = scalar_lea.vmem %s1227_s8, %s879_s28 }
  0x1c   : > { %881 = vmatmul.msk.bf16.vlgmr.msra.gmra.mxu0 %vm411_vm1, %v410_v2 }
  0x1d   : > { %672 = vmatpush.bf16.msrb.mxu0 %v417_v1 }
  0x99   : > { %v428_v4 = vpop.f32.mrf.mxu0 }
  0x9a   : > { %v432_v5 = vpack.c.bf16 %v428_v4, %v428_v4 }
  0x9c   : > { %433 = vst [vmem:[#allocation2 + $0x4] sm:$0x3] %v432_v5 }
  0xa1   : > { %v430_v6 = vpop.f32.mrf.mxu0 }
  0xa3   : > { %v472_v7 = vld [vmem:[#allocation2 + $0x4] sm:$0x3] }
  0xa4   : > { %v503_v8 = vld [vmem:[#allocation2 + $0x4] sm:$0x33]  ;;  %473 = vst [vmem:[#allocation3 + $0x8] sm:$0x3] %v472_v7  ;;  %v585_v7 = vld [vmem:[#allocation4] sm:$0xf] }
  0xa5   : > { %v484_v9 = vld [vmem:[#allocation2 + $0x4] sm:$0x33]  ;;  %505 = vrot.lane.b32.xlu0 %v503_v8, %s1071_s14 }
  0xa6   : > { %486 = vrot.lane.b32.xlu1 %v484_v9, %s1072_s15  ;;  %v434_v10 = vld [vmem:[#allocation2] sm:$0x33]  ;;  %v661_v8 = vld [vmem:[#allocation8] sm:$0xf] }
  0xa7   : > { %436 = vrot.lane.b32.xlu2 %v434_v10, %s1073_s16  ;;  %v493_v11 = vld [vmem:[#allocation2 + $0x4] sm:$0x33]  ;;  %905 = vmatmul.msk.bf16.vlgmr.msrb.gmra.mxu0 %vm411_vm1, %v661_v8 }
  0xa8   : > { %v474_v12 = vld [vmem:[#allocation2 + $0x4] sm:$0x33]  ;;  %v495_v14 = vrot.slane %v493_v11, 6 }
  0xa9   : > { %v443_v13 = vld [vmem:[#allocation2] sm:$0x33]  ;;  %v476_v15 = vrot.slane %v474_v12, 6 }
  0xaa   : > { %v445_v16 = vrot.slane %v443_v13, 6  ;;  %v462_v17 = vld [vmem:[#allocation2] sm:$0x33] }
  0xab   : > { %v464_v18 = vrot.slane %v462_v17, 6  ;;  %v453_v19 = vld [vmem:[#allocation2] sm:$0x33] }
  0xad   : > { %477 = vrot.lane.b32.xlu0 %v476_v15, %s1075_s18 }
  0xae   : > { %496 = vrot.lane.b32.xlu1 %v495_v14, %s1074_s17 }
  0xaf   : > { %446 = vrot.lane.b32.xlu2 %v445_v16, %s1076_s19 }
  0xb5   : > { %455 = vrot.lane.b32.xlu0 %v453_v19, %s1078_s21 }
  0xb6   : > { %465 = vrot.lane.b32.xlu1 %v464_v18, %s1077_s20 }
 0x101   : > { %v437_v20 = vpop.permute.xlu2 %436 }
 0x102   : > { %v438_v21 = vrot.slane %v437_v20, 4 }
 0x104   : > { %v440_v22 = vsel %vm439_vm2, %v437_v20, %v438_v21 }
 0x105   : > { %442 = vst [vmem:[#allocation3] sm:$0x3] %v440_v22 }
 0x109   : > { %v447_v23 = vpop.permute.xlu2 %446 }
 0x10a   : > { %v448_v24 = vrot.slane %v447_v23, 4 }
 0x10c   : > { %v450_v25 = vsel %vm449_vm3, %v447_v23, %v448_v24  ;;  %v632_v23 = vld [vmem:[#allocation6] sm:$0xf] }
 0x10d   : > { %452 = vst [vmem:[#allocation3] sm:$0xc] %v450_v25 }
 0x117   : > { %v506_v26 = vpop.permute.xlu0 %505 }
 0x118   : > { %v487_v27 = vpop.permute.xlu1 %486  ;;  %v507_v28 = vrot.slane %v506_v26, 4 }
 0x119   : > { %v488_v29 = vrot.slane %v487_v27, 4 }
 0x11a   : > { %v509_v30 = vsel %vm508_vm4, %v506_v26, %v507_v28 }
 0x11b   : > { %v490_v31 = vsel %vm489_vm5, %v487_v27, %v488_v29  ;;  %511 = vst [vmem:[#allocation3 + $0x10] sm:$0x3] %v509_v30 }
 0x11c   : > { %492 = vst [vmem:[#allocation3 + $0xc] sm:$0x3] %v490_v31 }
 0x11f   : > { %v478_v33 = vpop.permute.xlu0 %477 }
 0x120   : > { %v497_v32 = vpop.permute.xlu1 %496  ;;  %v479_v35 = vrot.slane %v478_v33, 4 }
 0x121   : > { %v498_v34 = vrot.slane %v497_v32, 4 }
 0x122   : > { %v481_v37 = vsel %vm480_vm7, %v478_v33, %v479_v35  ;;  %v517_v38 = vld [vmem:[#allocation3 + $0x10] sm:$0x3] }
 0x123   : > { %v500_v36 = vsel %vm499_vm6, %v497_v32, %v498_v34  ;;  %v527_v39 = vunpack.c.l.b16 %v517_v38  ;;  %483 = vst [vmem:[#allocation3 + $0x8] sm:$0xc] %v481_v37 }
 0x124   : > { %502 = vst [vmem:[#allocation3 + $0xc] sm:$0xc] %v500_v36  ;;  %v674_v15 = vpop.f32.mrf.mxu0 }
 0x125   : > { %v530_v40 = vpack.c.b16 %v527_v39, %v527_v39  ;;  %v678_v16 = vpack.c.bf16 %v674_v15, %v674_v15  ;;  %v684_v17 = vmul.f32 %v674_v15, %v674_v15 }
 0x127   : > { %v456_v42 = vpop.permute.xlu0 %455  ;;  %v539_v43 = vsel %vm537_vm8, %v530_v40, 0  ;;  %679 = vst [vmem:[%s394_s26] sm:$0xf] %v678_v16 }
 0x128   : > { %v466_v41 = vpop.permute.xlu1 %465  ;;  %v457_v45 = vrot.slane %v456_v42, 4  ;;  %546 = vmatpush.bf16.msra.mxu1 %v539_v43 }
 0x129   : > { %v467_v44 = vrot.slane %v466_v41, 4 }
 0x12a   : > { %v459_v47 = vsel %vm458_vm10, %v456_v42, %v457_v45 }
 0x12b   : > { %v469_v46 = vsel %vm468_vm9, %v466_v41, %v467_v44  ;;  %v909_v48 = vld [vmem:[#allocation3 + $0x8] sm:$0xff]  ;;  %461 = vst [vmem:[#allocation3 + $0x4] sm:$0x3] %v459_v47 }
 0x12c   : > { %471 = vst [vmem:[#allocation3 + $0x4] sm:$0xc] %v469_v46  ;;  %547 = vmatpush.bf16.msra.mxu1 %v909_v48  ;;  %v676_v21 = vpop.f32.mrf.mxu0 }
 0x133   : > { %v908_v49 = vld [vmem:[#allocation3] sm:$0xff] }
 0x134   : > { %548 = vmatpush.bf16.msra.mxu1 %v908_v49 }
 0x137   : > { %890 = vmatmul.msk.bf16.vlgmr.msra.gmra.mxu1 %vm533_vm11, %v512_v50 }
 0x1b4   : > { %v550_v53 = vpop.f32.mrf.mxu1 }
 0x1b5   : > { %v556_v54 = vsel %vm406_vm12, %v550_v53, 0.0 }
 0x1b6   : > { %v557_v55 = vpack.c.bf16 %v556_v54, %v556_v54 }
 0x1b8   : > { %558 = vst [vmem:[#allocation2 + $0x4] sm:$0xf] %v557_v55 }
 0x1bc   : > { %v552_v56 = vpop.f32.mrf.mxu1 }
 0x1bf   : > { %v577_v57 = vld [vmem:[#allocation2 + $0x4] sm:$0xff] }
 0x1c0   : > { %v559_v58 = vld [vmem:[#allocation2] sm:$0xff]  ;;  %579 = vrot.lane.b32.xlu0 %v577_v57, %s1072_s15  ;;  %571 = vrot.lane.b32.xlu2 %v577_v57, %s1075_s18  ;;  %s402_s15 = scalar_lea.vmem %s1228_s9, %s879_s28 }
 0x1c1   : > { %v567_v59 = vld [vmem:[#allocation2 + $0x4] sm:$0xf]  ;;  %561 = vrot.lane.b32.xlu1 %v559_v58, %s1077_s20 }
 0x1c2   : > { %568 = vst [vmem:[#allocation3 + $0x4] sm:$0xf] %v567_v59 }
 0x1ea   : > { %680 = vadd.xlane.f32.xlu0 %v674_v15 }
 0x1eb   : > { %685 = vadd.xlane.f32.xlu1 %v684_v17 }
 0x21a   : > { %v572_v60 = vpop.permute.xlu2 %571 }
 0x21b   : > { %v573_v61 = vrot.slane %v572_v60, 4 }
 0x21d   : > { %v574_v62 = vsel %vm480_vm7, %v572_v60, %v573_v61 }
 0x21e   : > { %576 = vst [vmem:[#allocation3 + $0x8] sm:$0xf] %v574_v62 }
 0x232   : > { %v580_v63 = vpop.permute.xlu0 %579 }
 0x233   : > { %v581_v0 = vrot.slane %v580_v63, 4  ;;  %v562_v1 = vpop.permute.xlu1 %561 }
 0x234   : > { %v563_v2 = vrot.slane %v562_v1, 4 }
 0x235   : > { %v582_v3 = vsel %vm489_vm5, %v580_v63, %v581_v0 }
 0x236   : > { %584 = vst [vmem:[#allocation3 + $0xc] sm:$0xf] %v582_v3  ;;  %v564_v4 = vsel %vm468_vm9, %v562_v1, %v563_v2 }
 0x237   : > { %566 = vst [vmem:[#allocation3] sm:$0xf] %v564_v4 }
 0x23d   : > { %v911_v5 = vld [vmem:[#allocation3 + $0x8] sm:$0xff] }
 0x23e   : > { %612 = vmatpush.bf16.msra.mxu2 %v911_v5  ;;  %v910_v6 = vld [vmem:[#allocation3] sm:$0xff] }
 0x242   : > { %613 = vmatpush.bf16.msra.mxu2 %v910_v6 }
 0x245   : > { %899 = vmatmul.msk.bf16.vlgmr.msra.gmra.mxu2 %vm602_vm13, %v585_v7 }
 0x25d   : > { %v681_v24 = vpop.xlane.xlu0 %680 }
 0x25e   : > { %v686_v25 = vpop.xlane.xlu1 %685  ;;  %683 = vst.msk [vmem:[%s398_s11] sm:$0xff] %vm468_vm9, %v681_v24 }
 0x25f   : > { %687 = vst.msk [vmem:[%s402_s15] sm:$0xff] %vm468_vm9, %v686_v25 }
 0x2c8   : > { %v615_v9 = vpop.f32.mrf.mxu2 }
 0x2c9   : > { %v619_v10 = vsel %vm406_vm12, %v615_v9, 0.0 }
 0x2ca   : > { %v620_v11 = vpack.c.bf16 %v619_v10, %v619_v10 }
 0x2cc   : > { %621 = vst [vmem:[#allocation2 + $0x4] sm:$0xf] %v620_v11 }
 0x2d0   : > { %v617_v12 = vpop.f32.mrf.mxu2 }
 0x2d3   : > { %v624_v13 = vld [vmem:[#allocation2 + $0x4] sm:$0xff] }
 0x2d4   : > { %v622_v14 = vld [vmem:[#allocation2 + $0x4] sm:$0xf]  ;;  %626 = vrot.lane.b32.xlu2 %v624_v13, %s1075_s18  ;;  %s390_s18 = scalar_lea.vmem %s1225_s6, %s1162_s27 }
 0x2d5   : > { %623 = vst [vmem:[#allocation3] sm:$0xf] %v622_v14 }
 0x32e   : > { %v627_v18 = vpop.permute.xlu2 %626 }
 0x32f   : > { %v628_v19 = vrot.slane %v627_v18, 4 }
 0x331   : > { %v629_v20 = vsel %vm480_vm7, %v627_v18, %v628_v19 }
 0x332   : > { %631 = vst [vmem:[#allocation3 + $0x4] sm:$0xf] %v629_v20 }
 0x339   : > { %v912_v22 = vld [vmem:[#allocation3] sm:$0xff] }
 0x33a   : > { %652 = vmatpush.bf16.msra.mxu3 %v912_v22 }
 0x33d   : > { %904 = vmatmul.msk.bf16.vlgmr.msra.gmra.mxu3 %vm641_vm14, %v632_v23 }
 0x3c0   : > { %v654_v26 = vpop.f32.mrf.mxu3 }
 0x3c1   : > { %v658_v27 = vsel %vm406_vm12, %v654_v26, 0.0 }
 0x3c2   : > { %v659_v28 = vpack.c.bf16 %v658_v27, %v658_v27 }
 0x3c4   : > { %660 = vst [vmem:[%s390_s18] sm:$0xf] %v659_v28 }
 0x3c8   : > { %v656_v29 = vpop.f32.mrf.mxu3 }
 0x3c9 PF: > { %s22_s30 = sadd.s32 1, %s1065_s30  }
 0x3ca   : > { %p19_p7 = scmp.ge.s32.totalorder %s22_s30, 4  }
 0x3cc   :  { %21 = sbr.rel (!%p19_p7) target bundleno = 2 (0x2), region = 123 }
 0x3d1   :  { %749 = vsyncpa [#allocation5], 1 }
 0x3d2   :  { %751 = vsyncpa [#allocation5 + $0x1], 1 }
 0x3d3   :  { %752 = vsyncpa [#allocation7], 1 }

</bundles_post_ra>
